<compile_context>
chip_gen: v5e
topology: v5e:2x2
jax: 0.10.0
libtpu: 0.0.40
codegen_flags: <defaults>
</compile_context>

<pallas_src>
import functools

import jax
import jax.numpy as jnp
import numpy as np
from jax.experimental import pallas as pl
from jax.experimental.pallas import tpu as pltpu

# ---------------- model dimensions ----------------
B = 2                 # batch
SNP = 32              # snp_number
IMG_F = 768           # image_features_num
GENE_F = 64           # gene_features_num
ATT_F = 2 * GENE_F    # concat feature width (128)
FUSE_F = 32           # fusion_features_num
C_IN, H, W = 3, 16, 16
PATCH = 4
STEM_C = 96           # convnext-tiny stem width
P = (H // PATCH) * (W // PATCH)       # patches per image = 16
PATCH_DIM = C_IN * PATCH * PATCH      # 48

BN_EPS = 1e-5
LN_EPS = 1e-6

# ---------------- packed parameter slab layout ----------------
SLAB_W = IMG_F        # 768 lanes, widest parameter row
R_POOL = 0            # rows [0, B): (B, B*P) average-pooling matrix
R_STEM_B = 2          # stem conv bias               (width STEM_C)
R_LN1_G = 3           # stem LayerNorm gamma         (width STEM_C)
R_LN1_B = 4           # stem LayerNorm beta          (width STEM_C)
R_PROJ_B = 5          # image head bias              (width IMG_F)
R_LN2_G = 6           # final LN gamma (bn_img folded in)   (width IMG_F)
R_LN2_B = 7           # final LN beta  (bn_img folded in)   (width IMG_F)
R_GENE_S = 8          # folded BN shift, gene path   (width GENE_F)
R_IG_S = 9            # folded BN shift, img->gene   (width GENE_F)
R_QKV_B = 10          # fused q|k|v bias             (width 3*ATT_F)
R_FUSE_S = 11         # folded BN shift, fusion      (width FUSE_F)
R_OUT_W = 12          # output head weight (as a row, width FUSE_F)
R_OUT_B = 13          # output head bias             (width 1)
SLAB_ROWS = 16        # padded to a multiple of 8 sublanes


# ---------------- in-kernel helpers ----------------
def _layernorm_affine(x, gamma, beta, n):
    inv_n = 1.0 / float(n)
    mu = jnp.sum(x, axis=-1, keepdims=True) * inv_n
    xc = x - mu
    var = jnp.sum(xc * xc, axis=-1, keepdims=True) * inv_n
    return xc * jax.lax.rsqrt(var + LN_EPS) * gamma + beta


# ---------------- the fused kernel ----------------
def fused_kernel(patches_ref, snps_ref, slab_ref,
                 stem_w_ref, proj_w_ref, gene_w_ref, ig_w_ref,
                 wqkv_ref, fuse_w_ref, y_ref):
    f32 = jnp.float32
    dot = functools.partial(jnp.dot, preferred_element_type=f32)

    # --- static slices into the packed parameter slab ---
    pool = slab_ref[R_POOL:R_POOL + B, :B * P]                   # (B, B*P)
    stem_b = slab_ref[R_STEM_B:R_STEM_B + 1, :STEM_C]
    ln1_g = slab_ref[R_LN1_G:R_LN1_G + 1, :STEM_C]
    ln1_b = slab_ref[R_LN1_B:R_LN1_B + 1, :STEM_C]
    proj_b = slab_ref[R_PROJ_B:R_PROJ_B + 1, :IMG_F]
    ln2_g = slab_ref[R_LN2_G:R_LN2_G + 1, :IMG_F]
    ln2_b = slab_ref[R_LN2_B:R_LN2_B + 1, :IMG_F]
    gene_shift = slab_ref[R_GENE_S:R_GENE_S + 1, :GENE_F]
    ig_shift = slab_ref[R_IG_S:R_IG_S + 1, :GENE_F]
    qkv_b = slab_ref[R_QKV_B:R_QKV_B + 1, :3 * ATT_F]
    fuse_shift = slab_ref[R_FUSE_S:R_FUSE_S + 1, :FUSE_F]
    out_w = slab_ref[R_OUT_W:R_OUT_W + 1, :FUSE_F]
    out_b = slab_ref[R_OUT_B:R_OUT_B + 1, 0:1]

    # ---- image path: simplified ConvNeXt (stem conv as matmul + LN + GAP + head) ----
    h = dot(patches_ref[...], stem_w_ref[...]) + stem_b          # (B*P, 96)
    h = _layernorm_affine(h, ln1_g, ln1_b, STEM_C)
    pooled = dot(pool, h)                                        # (B, 96) global avg pool
    img = dot(pooled, proj_w_ref[...]) + proj_b                  # (B, 768)
    # final LayerNorm with BatchNorm1d(768) folded into gamma/beta, then ReLU
    image_feature = jnp.maximum(_layernorm_affine(img, ln2_g, ln2_b, IMG_F), 0.0)

    # ---- gene path: Linear(SNP -> 64, no bias) with BN folded in, + ReLU ----
    gene_feature = jnp.maximum(dot(snps_ref[...], gene_w_ref[...]) + gene_shift, 0.0)

    # ---- image->gene projection: Linear(768 -> 64, no bias) with BN folded in, + ReLU ----
    ig_feature = jnp.maximum(dot(image_feature, ig_w_ref[...]) + ig_shift, 0.0)

    # ---- self-attention fusion on x = concat([ig_feature, gene_feature], dim=1) (B, 128) ----
    x = jnp.concatenate([ig_feature, gene_feature], axis=-1)     # (B, 128)
    qkv = dot(x, wqkv_ref[...]) + qkv_b                          # (B, 384) single fused matmul
    q = qkv[:, 0:ATT_F]
    k = qkv[:, ATT_F:2 * ATT_F]
    v = qkv[:, 2 * ATT_F:3 * ATT_F]

    scale = 1.0 / jnp.sqrt(jnp.float32(ATT_F))
    scores = jax.lax.dot_general(q, k, (((1,), (1,)), ((), ())),
                                 preferred_element_type=f32) * scale   # (B, B)
    scores = scores - jnp.max(scores, axis=-1, keepdims=True)
    p = jnp.exp(scores)
    attn = p * pl.reciprocal(jnp.sum(p, axis=-1, keepdims=True), approx=True)
    attn_out = dot(attn, v)                                      # (B, 128)

    # ---- Linear(128 -> 32, BN folded) + ReLU + Linear(32 -> 1) ----
    fused = jnp.maximum(dot(attn_out, fuse_w_ref[...]) + fuse_shift, 0.0)   # (B, 32)
    y_ref[...] = jnp.sum(fused * out_w, axis=-1, keepdims=True) + out_b     # (B, 1)


# ---------------- JAX glue / wrapper ----------------
def patchify_nchw(img):
    """(B, C, H, W) NCHW -> (B*P, C*PATCH*PATCH) patch matrix."""
    b, c, h, w = img.shape
    x = img.reshape(b, c, h // PATCH, PATCH, w // PATCH, PATCH)
    x = x.transpose(0, 2, 4, 1, 3, 5)                 # B, H/p, W/p, C, p, p
    return x.reshape(b * (h // PATCH) * (w // PATCH), c * PATCH * PATCH)


def _bn_scale_shift(bn):
    """bn rows: [gamma, beta, running_mean, running_var] -> inference scale/shift."""
    g, b, m, v = bn[0], bn[1], bn[2], bn[3]
    s = g * jax.lax.rsqrt(v + BN_EPS)
    return s, b - m * s


def prepare_kernel_params(params):
    """Host-side packing/folding (runs as plain XLA ops outside the kernel)."""
    # fold BatchNorm1d into bias-free Linears (exact in inference mode)
    s_gene, sh_gene = _bn_scale_shift(params["bn_gene"])
    s_ig, sh_ig = _bn_scale_shift(params["bn_ig"])
    s_fuse, sh_fuse = _bn_scale_shift(params["bn_fuse"])
    gene_w_f = params["gene_w"] * s_gene[None, :]
    ig_w_f = params["ig_w"] * s_ig[None, :]
    fuse_w_f = params["fuse_w"] * s_fuse[None, :]

    # fold BatchNorm1d(IMG_F) into the convnext final LayerNorm affine
    s_img, sh_img = _bn_scale_shift(params["bn_img"])
    ln2_g = params["ln2"][0] * s_img
    ln2_b = params["ln2"][1] * s_img + sh_img

    # fused Q|K|V weight & bias
    wqkv = jnp.concatenate([params["wq"], params["wk"], params["wv"]], axis=1)  # (128, 384)
    qkv_b = jnp.concatenate([params["qkv_b"][0], params["qkv_b"][1],
                             params["qkv_b"][2]], axis=0)                        # (384,)

    # per-sample average pooling matrix
    pool_mat = jnp.kron(jnp.eye(B, dtype=jnp.float32),
                        jnp.full((1, P), 1.0 / P, jnp.float32))                  # (B, B*P)

    slab = jnp.zeros((SLAB_ROWS, SLAB_W), jnp.float32)
    slab = slab.at[R_POOL:R_POOL + B, :B * P].set(pool_mat)
    slab = slab.at[R_STEM_B, :STEM_C].set(params["stem_b"][0])
    slab = slab.at[R_LN1_G, :STEM_C].set(params["ln1"][0])
    slab = slab.at[R_LN1_B, :STEM_C].set(params["ln1"][1])
    slab = slab.at[R_PROJ_B, :IMG_F].set(params["proj_b"][0])
    slab = slab.at[R_LN2_G, :IMG_F].set(ln2_g)
    slab = slab.at[R_LN2_B, :IMG_F].set(ln2_b)
    slab = slab.at[R_GENE_S, :GENE_F].set(sh_gene)
    slab = slab.at[R_IG_S, :GENE_F].set(sh_ig)
    slab = slab.at[R_QKV_B, :3 * ATT_F].set(qkv_b)
    slab = slab.at[R_FUSE_S, :FUSE_F].set(sh_fuse)
    slab = slab.at[R_OUT_W, :FUSE_F].set(params["out_w"][:, 0])
    slab = slab.at[R_OUT_B, 0].set(params["out_b"][0, 0])

    return {
        "slab": slab,
        "stem_w": params["stem_w"],
        "proj_w": params["proj_w"],
        "gene_w_f": gene_w_f,
        "ig_w_f": ig_w_f,
        "wqkv": wqkv,
        "fuse_w_f": fuse_w_f,
    }


def self_attention_multimodal_forward(params, snps, image):
    kp = prepare_kernel_params(params)
    patches = patchify_nchw(image).astype(jnp.float32)               # (B*P, 48)

    args = (
        patches, snps.astype(jnp.float32), kp["slab"],
        kp["stem_w"], kp["proj_w"], kp["gene_w_f"], kp["ig_w_f"],
        kp["wqkv"], kp["fuse_w_f"],
    )
    vmem = pl.BlockSpec(memory_space=pltpu.MemorySpace.VMEM)
    return pl.pallas_call(
        fused_kernel,
        out_shape=jax.ShapeDtypeStruct((B, 1), jnp.float32),
        in_specs=[vmem] * len(args),
        out_specs=vmem,
    )(*args)


# ---------------- pure-JAX reference (for a sanity check) ----------------
def reference_forward(params, snps, image):
    patches = patchify_nchw(image).astype(jnp.float32)

    def ln(x, p):
        mu = x.mean(-1, keepdims=True)
        var = ((x - mu) ** 2).mean(-1, keepdims=True)
        return (x - mu) / jnp.sqrt(var + LN_EPS) * p[0] + p[1]

    def bn_relu(x, p):
        return jnp.maximum((x - p[2]) / jnp.sqrt(p[3] + BN_EPS) * p[0] + p[1], 0.0)

    h = ln(patches @ params["stem_w"] + params["stem_b"], params["ln1"])
    pooled = h.reshape(B, P, STEM_C).mean(axis=1)
    img = ln(pooled @ params["proj_w"] + params["proj_b"], params["ln2"])
    image_feature = bn_relu(img, params["bn_img"])
    gene_feature = bn_relu(snps @ params["gene_w"], params["bn_gene"])
    ig_feature = bn_relu(image_feature @ params["ig_w"], params["bn_ig"])
    x = jnp.concatenate([ig_feature, gene_feature], axis=1)
    q = x @ params["wq"] + params["qkv_b"][0]
    k = x @ params["wk"] + params["qkv_b"][1]
    v = x @ params["wv"] + params["qkv_b"][2]
    attn = jax.nn.softmax(q @ k.T / jnp.sqrt(jnp.float32(ATT_F)), axis=-1)
    fused = bn_relu((attn @ v) @ params["fuse_w"], params["bn_fuse"])
    return fused @ params["out_w"] + params["out_b"]


# ---------------- deterministic parameter init ----------------
def init_params(key):
    def trunc_normal(k, shape, std=0.2):
        return jnp.clip(std * jax.random.normal(k, shape), -2 * std, 2 * std).astype(jnp.float32)

    def bn_init(c):   # [gamma, beta, running_mean, running_var] as in nn.BatchNorm1d.__init__
        return jnp.stack([jnp.ones((c,)), jnp.zeros((c,)),
                          jnp.zeros((c,)), jnp.ones((c,))]).astype(jnp.float32)

    def ln_init(c):   # [gamma, beta]
        return jnp.stack([jnp.ones((c,)), jnp.zeros((c,))]).astype(jnp.float32)

    ks = jax.random.split(key, 10)
    return {
        "stem_w": trunc_normal(ks[0], (PATCH_DIM, STEM_C)),
        "stem_b": jnp.zeros((1, STEM_C), jnp.float32),
        "ln1": ln_init(STEM_C),
        "proj_w": trunc_normal(ks[1], (STEM_C, IMG_F)),
        "proj_b": jnp.zeros((1, IMG_F), jnp.float32),
        "ln2": ln_init(IMG_F),
        "bn_img": bn_init(IMG_F),
        "gene_w": trunc_normal(ks[2], (SNP, GENE_F)),
        "bn_gene": bn_init(GENE_F),
        "ig_w": trunc_normal(ks[3], (IMG_F, GENE_F)),
        "bn_ig": bn_init(GENE_F),
        "wq": trunc_normal(ks[4], (ATT_F, ATT_F)),
        "wk": trunc_normal(ks[5], (ATT_F, ATT_F)),
        "wv": trunc_normal(ks[6], (ATT_F, ATT_F)),
        "qkv_b": jnp.zeros((3, ATT_F), jnp.float32),
        "fuse_w": trunc_normal(ks[7], (ATT_F, FUSE_F)),
        "bn_fuse": bn_init(FUSE_F),
        "out_w": trunc_normal(ks[8], (FUSE_F, 1)),
        "out_b": jnp.zeros((1, 1), jnp.float32),
    }


if __name__ == "__main__":
    key = jax.random.PRNGKey(0)
    k_param, k_snp, k_img = jax.random.split(key, 3)

    params = init_params(k_param)
    snps = jax.random.normal(k_snp, (B, SNP), dtype=jnp.float32)
    image = jax.random.normal(k_img, (B, C_IN, H, W), dtype=jnp.float32)   # NCHW

    y = self_attention_multimodal_forward(params, snps, image)
    y = jax.block_until_ready(y)

    y_ref = jax.block_until_ready(reference_forward(params, snps, image))
    np.testing.assert_allclose(np.asarray(y), np.asarray(y_ref), rtol=2e-2, atol=2e-2)

    assert y.shape == (B, 1)
    print("KERNEL_OK")
</pallas_src>

<mosaic_0001>
module attributes {stable_mosaic.version = 11 : i64} {
  func.func @fused_kernel(%arg0: memref<32x48xf32, #tpu.memory_space<vmem>>, %arg1: memref<2x32xf32, #tpu.memory_space<vmem>>, %arg2: memref<16x768xf32, #tpu.memory_space<vmem>>, %arg3: memref<48x96xf32, #tpu.memory_space<vmem>>, %arg4: memref<96x768xf32, #tpu.memory_space<vmem>>, %arg5: memref<32x64xf32, #tpu.memory_space<vmem>>, %arg6: memref<768x64xf32, #tpu.memory_space<vmem>>, %arg7: memref<128x384xf32, #tpu.memory_space<vmem>>, %arg8: memref<128x32xf32, #tpu.memory_space<vmem>>, %arg9: memref<2x1xf32, #tpu.memory_space<vmem>>) attributes {dimension_semantics = [], scalar_prefetch = 0 : i64, scratch_operands = 0 : i64, tpu.core_type = #tpu.core_type<tc>} {
    %c0 = arith.constant 0 : index
    %c0_0 = arith.constant 0 : index
    %0 = vector.load %arg2[%c0, %c0_0] : memref<16x768xf32, #tpu.memory_space<vmem>>, vector<2x32xf32>
    %c2 = arith.constant 2 : index
    %c0_1 = arith.constant 0 : index
    %1 = vector.load %arg2[%c2, %c0_1] : memref<16x768xf32, #tpu.memory_space<vmem>>, vector<1x96xf32>
    %c3 = arith.constant 3 : index
    %c0_2 = arith.constant 0 : index
    %2 = vector.load %arg2[%c3, %c0_2] : memref<16x768xf32, #tpu.memory_space<vmem>>, vector<1x96xf32>
    %c4 = arith.constant 4 : index
    %c0_3 = arith.constant 0 : index
    %3 = vector.load %arg2[%c4, %c0_3] : memref<16x768xf32, #tpu.memory_space<vmem>>, vector<1x96xf32>
    %c5 = arith.constant 5 : index
    %c0_4 = arith.constant 0 : index
    %4 = vector.load %arg2[%c5, %c0_4] : memref<16x768xf32, #tpu.memory_space<vmem>>, vector<1x768xf32>
    %c6 = arith.constant 6 : index
    %c0_5 = arith.constant 0 : index
    %5 = vector.load %arg2[%c6, %c0_5] : memref<16x768xf32, #tpu.memory_space<vmem>>, vector<1x768xf32>
    %c7 = arith.constant 7 : index
    %c0_6 = arith.constant 0 : index
    %6 = vector.load %arg2[%c7, %c0_6] : memref<16x768xf32, #tpu.memory_space<vmem>>, vector<1x768xf32>
    %c8 = arith.constant 8 : index
    %c0_7 = arith.constant 0 : index
    %7 = vector.load %arg2[%c8, %c0_7] : memref<16x768xf32, #tpu.memory_space<vmem>>, vector<1x64xf32>
    %c9 = arith.constant 9 : index
    %c0_8 = arith.constant 0 : index
    %8 = vector.load %arg2[%c9, %c0_8] : memref<16x768xf32, #tpu.memory_space<vmem>>, vector<1x64xf32>
    %c10 = arith.constant 10 : index
    %c0_9 = arith.constant 0 : index
    %9 = vector.load %arg2[%c10, %c0_9] : memref<16x768xf32, #tpu.memory_space<vmem>>, vector<1x384xf32>
    %c11 = arith.constant 11 : index
    %c0_10 = arith.constant 0 : index
    %10 = vector.load %arg2[%c11, %c0_10] : memref<16x768xf32, #tpu.memory_space<vmem>>, vector<1x32xf32>
    %c12 = arith.constant 12 : index
    %c0_11 = arith.constant 0 : index
    %11 = vector.load %arg2[%c12, %c0_11] : memref<16x768xf32, #tpu.memory_space<vmem>>, vector<1x32xf32>
    %c13 = arith.constant 13 : index
    %c0_12 = arith.constant 0 : index
    %12 = vector.load %arg2[%c13, %c0_12] : memref<16x768xf32, #tpu.memory_space<vmem>>, vector<1x1xf32>
    %c0_13 = arith.constant 0 : index
    %c0_14 = arith.constant 0 : index
    %13 = vector.load %arg0[%c0_13, %c0_14] : memref<32x48xf32, #tpu.memory_space<vmem>>, vector<32x48xf32>
    %c0_15 = arith.constant 0 : index
    %c0_16 = arith.constant 0 : index
    %14 = vector.load %arg3[%c0_15, %c0_16] : memref<48x96xf32, #tpu.memory_space<vmem>>, vector<48x96xf32>
    %cst = arith.constant dense<0.000000e+00> : vector<32x96xf32>
    %15 = tpu.matmul %13, %14, %cst {dimension_numbers = #tpu.dot_dimension_numbers<[1], [0], [0], [1], [0, 0, 1, 1], [], []>} : vector<32x48xf32>, vector<48x96xf32>, vector<32x96xf32> -> vector<32x96xf32>
    %16 = vector.broadcast %1 : vector<1x96xf32> to vector<32x96xf32>
    %17 = arith.addf %15, %16 : vector<32x96xf32>
    %cst_17 = arith.constant dense<0.000000e+00> : vector<32xf32>
    %18 = vector.multi_reduction <add>, %17, %cst_17 [1] : vector<32x96xf32> to vector<32xf32>
    %19 = vector.shape_cast %18 : vector<32xf32> to vector<32x1xf32>
    %cst_18 = arith.constant 0.010416667 : f32
    %20 = vector.broadcast %cst_18 : f32 to vector<32x1xf32>
    %21 = arith.mulf %19, %20 : vector<32x1xf32>
    %22 = vector.broadcast %21 : vector<32x1xf32> to vector<32x96xf32>
    %23 = arith.subf %17, %22 : vector<32x96xf32>
    %24 = arith.mulf %23, %23 : vector<32x96xf32>
    %cst_19 = arith.constant dense<0.000000e+00> : vector<32xf32>
    %25 = vector.multi_reduction <add>, %24, %cst_19 [1] : vector<32x96xf32> to vector<32xf32>
    %26 = vector.shape_cast %25 : vector<32xf32> to vector<32x1xf32>
    %cst_20 = arith.constant 0.010416667 : f32
    %27 = vector.broadcast %cst_20 : f32 to vector<32x1xf32>
    %28 = arith.mulf %26, %27 : vector<32x1xf32>
    %cst_21 = arith.constant 9.99999997E-7 : f32
    %29 = vector.broadcast %cst_21 : f32 to vector<32x1xf32>
    %30 = arith.addf %28, %29 : vector<32x1xf32>
    %31 = math.rsqrt %30 : vector<32x1xf32>
    %32 = vector.broadcast %31 : vector<32x1xf32> to vector<32x96xf32>
    %33 = arith.mulf %23, %32 : vector<32x96xf32>
    %34 = vector.broadcast %2 : vector<1x96xf32> to vector<32x96xf32>
    %35 = arith.mulf %33, %34 : vector<32x96xf32>
    %36 = vector.broadcast %3 : vector<1x96xf32> to vector<32x96xf32>
    %37 = arith.addf %35, %36 : vector<32x96xf32>
    %cst_22 = arith.constant dense<0.000000e+00> : vector<2x96xf32>
    %38 = tpu.matmul %0, %37, %cst_22 {dimension_numbers = #tpu.dot_dimension_numbers<[1], [0], [0], [1], [0, 0, 1, 1], [], []>} : vector<2x32xf32>, vector<32x96xf32>, vector<2x96xf32> -> vector<2x96xf32>
    %c0_23 = arith.constant 0 : index
    %c0_24 = arith.constant 0 : index
    %39 = vector.load %arg4[%c0_23, %c0_24] : memref<96x768xf32, #tpu.memory_space<vmem>>, vector<96x768xf32>
    %cst_25 = arith.constant dense<0.000000e+00> : vector<2x768xf32>
    %40 = tpu.matmul %38, %39, %cst_25 {dimension_numbers = #tpu.dot_dimension_numbers<[1], [0], [0], [1], [0, 0, 1, 1], [], []>} : vector<2x96xf32>, vector<96x768xf32>, vector<2x768xf32> -> vector<2x768xf32>
    %41 = vector.broadcast %4 : vector<1x768xf32> to vector<2x768xf32>
    %42 = arith.addf %40, %41 : vector<2x768xf32>
    %cst_26 = arith.constant dense<0.000000e+00> : vector<2xf32>
    %43 = vector.multi_reduction <add>, %42, %cst_26 [1] : vector<2x768xf32> to vector<2xf32>
    %44 = vector.shape_cast %43 : vector<2xf32> to vector<2x1xf32>
    %cst_27 = arith.constant 0.00130208337 : f32
    %45 = vector.broadcast %cst_27 : f32 to vector<2x1xf32>
    %46 = arith.mulf %44, %45 : vector<2x1xf32>
    %47 = vector.broadcast %46 : vector<2x1xf32> to vector<2x768xf32>
    %48 = arith.subf %42, %47 : vector<2x768xf32>
    %49 = arith.mulf %48, %48 : vector<2x768xf32>
    %cst_28 = arith.constant dense<0.000000e+00> : vector<2xf32>
    %50 = vector.multi_reduction <add>, %49, %cst_28 [1] : vector<2x768xf32> to vector<2xf32>
    %51 = vector.shape_cast %50 : vector<2xf32> to vector<2x1xf32>
    %cst_29 = arith.constant 0.00130208337 : f32
    %52 = vector.broadcast %cst_29 : f32 to vector<2x1xf32>
    %53 = arith.mulf %51, %52 : vector<2x1xf32>
    %cst_30 = arith.constant 9.99999997E-7 : f32
    %54 = vector.broadcast %cst_30 : f32 to vector<2x1xf32>
    %55 = arith.addf %53, %54 : vector<2x1xf32>
    %56 = math.rsqrt %55 : vector<2x1xf32>
    %57 = vector.broadcast %56 : vector<2x1xf32> to vector<2x768xf32>
    %58 = arith.mulf %48, %57 : vector<2x768xf32>
    %59 = vector.broadcast %5 : vector<1x768xf32> to vector<2x768xf32>
    %60 = arith.mulf %58, %59 : vector<2x768xf32>
    %61 = vector.broadcast %6 : vector<1x768xf32> to vector<2x768xf32>
    %62 = arith.addf %60, %61 : vector<2x768xf32>
    %cst_31 = arith.constant 0.000000e+00 : f32
    %63 = vector.broadcast %cst_31 : f32 to vector<2x768xf32>
    %64 = arith.maximumf %62, %63 : vector<2x768xf32>
    %c0_32 = arith.constant 0 : index
    %c0_33 = arith.constant 0 : index
    %65 = vector.load %arg1[%c0_32, %c0_33] : memref<2x32xf32, #tpu.memory_space<vmem>>, vector<2x32xf32>
    %c0_34 = arith.constant 0 : index
    %c0_35 = arith.constant 0 : index
    %66 = vector.load %arg5[%c0_34, %c0_35] : memref<32x64xf32, #tpu.memory_space<vmem>>, vector<32x64xf32>
    %cst_36 = arith.constant dense<0.000000e+00> : vector<2x64xf32>
    %67 = tpu.matmul %65, %66, %cst_36 {dimension_numbers = #tpu.dot_dimension_numbers<[1], [0], [0], [1], [0, 0, 1, 1], [], []>} : vector<2x32xf32>, vector<32x64xf32>, vector<2x64xf32> -> vector<2x64xf32>
    %68 = vector.broadcast %7 : vector<1x64xf32> to vector<2x64xf32>
    %69 = arith.addf %67, %68 : vector<2x64xf32>
    %cst_37 = arith.constant 0.000000e+00 : f32
    %70 = vector.broadcast %cst_37 : f32 to vector<2x64xf32>
    %71 = arith.maximumf %69, %70 : vector<2x64xf32>
    %c0_38 = arith.constant 0 : index
    %c0_39 = arith.constant 0 : index
    %72 = vector.load %arg6[%c0_38, %c0_39] : memref<768x64xf32, #tpu.memory_space<vmem>>, vector<768x64xf32>
    %cst_40 = arith.constant dense<0.000000e+00> : vector<2x64xf32>
    %73 = tpu.matmul %64, %72, %cst_40 {dimension_numbers = #tpu.dot_dimension_numbers<[1], [0], [0], [1], [0, 0, 1, 1], [], []>} : vector<2x768xf32>, vector<768x64xf32>, vector<2x64xf32> -> vector<2x64xf32>
    %74 = vector.broadcast %8 : vector<1x64xf32> to vector<2x64xf32>
    %75 = arith.addf %73, %74 : vector<2x64xf32>
    %cst_41 = arith.constant 0.000000e+00 : f32
    %76 = vector.broadcast %cst_41 : f32 to vector<2x64xf32>
    %77 = arith.maximumf %75, %76 : vector<2x64xf32>
    %78 = tpu.concatenate %77, %71 in 1 : vector<2x64xf32>, vector<2x64xf32> -> vector<2x128xf32>
    %c0_42 = arith.constant 0 : index
    %c0_43 = arith.constant 0 : index
    %79 = vector.load %arg7[%c0_42, %c0_43] : memref<128x384xf32, #tpu.memory_space<vmem>>, vector<128x384xf32>
    %cst_44 = arith.constant dense<0.000000e+00> : vector<2x384xf32>
    %80 = tpu.matmul %78, %79, %cst_44 {dimension_numbers = #tpu.dot_dimension_numbers<[1], [0], [0], [1], [0, 0, 1, 1], [], []>} : vector<2x128xf32>, vector<128x384xf32>, vector<2x384xf32> -> vector<2x384xf32>
    %81 = vector.broadcast %9 : vector<1x384xf32> to vector<2x384xf32>
    %82 = arith.addf %80, %81 : vector<2x384xf32>
    %83 = vector.extract_strided_slice %82 {offsets = [0, 0], sizes = [2, 128], strides = [1, 1]} : vector<2x384xf32> to vector<2x128xf32>
    %84 = vector.extract_strided_slice %82 {offsets = [0, 128], sizes = [2, 128], strides = [1, 1]} : vector<2x384xf32> to vector<2x128xf32>
    %85 = vector.extract_strided_slice %82 {offsets = [0, 256], sizes = [2, 128], strides = [1, 1]} : vector<2x384xf32> to vector<2x128xf32>
    %cst_45 = arith.constant 1.280000e+02 : f32
    %86 = math.sqrt %cst_45 : f32
    %cst_46 = arith.constant 1.000000e+00 : f32
    %87 = arith.divf %cst_46, %86 : f32
    %cst_47 = arith.constant dense<0.000000e+00> : vector<2x2xf32>
    %88 = tpu.matmul %83, %84, %cst_47 {dimension_numbers = #tpu.dot_dimension_numbers<[1], [1], [0], [0], [0, 0, 1, 0], [], []>} : vector<2x128xf32>, vector<2x128xf32>, vector<2x2xf32> -> vector<2x2xf32>
    %89 = vector.broadcast %87 : f32 to vector<2x2xf32>
    %90 = arith.mulf %88, %89 : vector<2x2xf32>
    %cst_48 = arith.constant dense<0xFF800000> : vector<2xf32>
    %91 = vector.multi_reduction <maximumf>, %90, %cst_48 [1] : vector<2x2xf32> to vector<2xf32>
    %92 = vector.shape_cast %91 : vector<2xf32> to vector<2x1xf32>
    %93 = vector.broadcast %92 : vector<2x1xf32> to vector<2x2xf32>
    %94 = arith.subf %90, %93 : vector<2x2xf32>
    %95 = math.exp %94 : vector<2x2xf32>
    %cst_49 = arith.constant dense<0.000000e+00> : vector<2xf32>
    %96 = vector.multi_reduction <add>, %95, %cst_49 [1] : vector<2x2xf32> to vector<2xf32>
    %97 = vector.shape_cast %96 : vector<2xf32> to vector<2x1xf32>
    %98 = tpu.reciprocal %97 {approx = true} : vector<2x1xf32> -> vector<2x1xf32>
    %99 = vector.broadcast %98 : vector<2x1xf32> to vector<2x2xf32>
    %100 = arith.mulf %95, %99 : vector<2x2xf32>
    %cst_50 = arith.constant dense<0.000000e+00> : vector<2x128xf32>
    %101 = tpu.matmul %100, %85, %cst_50 {dimension_numbers = #tpu.dot_dimension_numbers<[1], [0], [0], [1], [0, 0, 1, 1], [], []>} : vector<2x2xf32>, vector<2x128xf32>, vector<2x128xf32> -> vector<2x128xf32>
    %c0_51 = arith.constant 0 : index
    %c0_52 = arith.constant 0 : index
    %102 = vector.load %arg8[%c0_51, %c0_52] : memref<128x32xf32, #tpu.memory_space<vmem>>, vector<128x32xf32>
    %cst_53 = arith.constant dense<0.000000e+00> : vector<2x32xf32>
    %103 = tpu.matmul %101, %102, %cst_53 {dimension_numbers = #tpu.dot_dimension_numbers<[1], [0], [0], [1], [0, 0, 1, 1], [], []>} : vector<2x128xf32>, vector<128x32xf32>, vector<2x32xf32> -> vector<2x32xf32>
    %104 = vector.broadcast %10 : vector<1x32xf32> to vector<2x32xf32>
    %105 = arith.addf %103, %104 : vector<2x32xf32>
    %cst_54 = arith.constant 0.000000e+00 : f32
    %106 = vector.broadcast %cst_54 : f32 to vector<2x32xf32>
    %107 = arith.maximumf %105, %106 : vector<2x32xf32>
    %108 = vector.broadcast %11 : vector<1x32xf32> to vector<2x32xf32>
    %109 = arith.mulf %107, %108 : vector<2x32xf32>
    %cst_55 = arith.constant dense<0.000000e+00> : vector<2xf32>
    %110 = vector.multi_reduction <add>, %109, %cst_55 [1] : vector<2x32xf32> to vector<2xf32>
    %111 = vector.shape_cast %110 : vector<2xf32> to vector<2x1xf32>
    %112 = vector.broadcast %12 : vector<1x1xf32> to vector<2x1xf32>
    %113 = arith.addf %111, %112 : vector<2x1xf32>
    %c0_56 = arith.constant 0 : index
    %c0_57 = arith.constant 0 : index
    %114 = vector.load %arg9[%c0_56, %c0_57] : memref<2x1xf32, #tpu.memory_space<vmem>>, vector<2x1xf32>
    tpu.vector_store %arg9[%c0_56, %c0_57], %113 {strides = array<i32>} : memref<2x1xf32, #tpu.memory_space<vmem>>, vector<2x1xf32>,
    return
  }
}

</mosaic_0001>

<bundles_post_ra>
// kernel: tpu_custom_call.1
= control target key start
LH: loop header
LB: loop body
LE: loop exit
PB: predicated region body
PF: predicated region fallthrough
CT: control target
= control target key end

     0   :  { %vm65_vm0 = vcmask 392192   ;;  %vm107_vm1 = vcmask 785408   ;;  %vm204_vm14 = vcmask 261120   ;;  %vm436_vm15 = vcmask 1041408   ;;  %s1056_s30 = smov 64   ;;  %s2055_s3 = inlined_call_operand.vmem [shape: f32[48,96], index: 3, kind: input, shape index: {}]   ;;  %s2056_s0 = inlined_call_operand.vmem [shape: f32[32,48], index: 0, kind: input, shape index: {}]   ;;  %s2057_s2 = inlined_call_operand.vmem [shape: f32[16,768], index: 2, kind: input, shape index: {}]   ;;  %s2058_s4 = inlined_call_operand.vmem [shape: f32[96,768], index: 4, kind: input, shape index: {}]   ;;  %s2059_s5 = inlined_call_operand.vmem [shape: f32[32,64], index: 5, kind: input, shape index: {}]   ;;  %s2060_s6 = inlined_call_operand.vmem [shape: f32[768,64], index: 6, kind: input, shape index: {}]   ;;  %s2061_s1 = inlined_call_operand.vmem [shape: f32[2,32], index: 1, kind: input, shape index: {}]   ;;  %s2062_s7 = inlined_call_operand.vmem [shape: f32[128,384], index: 7, kind: input, shape index: {}]   ;;  %s2063_s8 = inlined_call_operand.vmem [shape: f32[128,32], index: 8, kind: input, shape index: {}]   ;;  %s2064_s9 = inlined_call_operand.vmem [shape: f32[2,1], index: 9, kind: output, shape index: {}]  }
   0x1   :  { %v64_v0 = vld [vmem:[%s2055_s3 + $0x28] sm:$0xff]  ;;  %v63_v1 = vld [vmem:[%s2055_s3 + $0x20] sm:$0xff]  ;;  %v62_v2 = vld [vmem:[%s2055_s3 + $0x18] sm:$0xff] }
   0x2   :  { %88 = vmatpush.msra.mxu0 %v64_v0  ;;  %1035 = vmatpush.msra.mxu2 %v64_v0  ;;  %v61_v3 = vld [vmem:[%s2055_s3 + $0x10] sm:$0xff]  ;;  %v60_v4 = vld [vmem:[%s2055_s3 + $0x8] sm:$0xff]  ;;  %v59_v5 = vld [vmem:[%s2055_s3] sm:$0xff] }
   0x3   :  { %v55_v6 = vld [vmem:[%s2056_s0] sm:$0xff]  ;;  %v58_v7 = vld [vmem:[%s2056_s0 + $0x18] sm:$0xff]  ;;  %v56_v8 = vld [vmem:[%s2056_s0 + $0x8] sm:$0xff] }
   0x4   :  { %89 = vmatpush.msra.mxu0 %v63_v1  ;;  %1036 = vmatpush.msra.mxu2 %v63_v1  ;;  %v57_v9 = vld [vmem:[%s2056_s0 + $0x10] sm:$0xff]  ;;  %v33_v11 = vld [vmem:[%s2057_s2 + $0x2] ss:$0 sm:$0xff]  ;;  %v295_v56 = vld [vmem:[%s2058_s4 + $0x218] sm:$0xff] }
   0x5   :  { %v294_v55 = vld [vmem:[%s2058_s4 + $0x210] sm:$0xff]  ;;  %v288_v57 = vld [vmem:[%s2058_s4 + $0x1e0] sm:$0xff]  ;;  %v289_v61 = vld [vmem:[%s2058_s4 + $0x1e8] sm:$0xff] }
   0x6   :  { %90 = vmatpush.msra.mxu0 %v62_v2  ;;  %1037 = vmatpush.msra.mxu2 %v62_v2  ;;  %v282_v0 = vld [vmem:[%s2058_s4 + $0x1b0] sm:$0xff]  ;;  %v283_v1 = vld [vmem:[%s2058_s4 + $0x1b8] sm:$0xff] }
   0x8   :  { %91 = vmatpush.msra.mxu0 %v61_v3  ;;  %1038 = vmatpush.msra.mxu2 %v61_v3 }
   0xa   :  { %92 = vmatpush.msra.mxu0 %v60_v4  ;;  %1039 = vmatpush.msra.mxu2 %v60_v4  ;;  %v276_v4 = vld [vmem:[%s2058_s4 + $0x180] sm:$0xff] }
   0xc   :  { %93 = vmatpush.msra.mxu0 %v59_v5  ;;  %1040 = vmatpush.msra.mxu2 %v59_v5  ;;  %v277_v5 = vld [vmem:[%s2058_s4 + $0x188] sm:$0xff] }
   0xd   :  { %1021 = vmatmul.msk.f32.vlgmr.msra.gmra.mxu0 %vm65_vm0, %v55_v6  ;;  %1024 = vmatmul.msk.f32.vlgmr.msra.gmra.mxu2 %vm65_vm0, %v58_v7 }
   0xe   :  { %320 = vmatpush.msrb.mxu2 %v294_v55  ;;  %340 = vmatpush.msrb.mxu0 %v295_v56  ;;  %v235_v55 = vld [vmem:[%s2058_s4 + $0x38] sm:$0xff]  ;;  %v254_v56 = vld [vmem:[%s2058_s4 + $0xd0] sm:$0xff] }
  0x10   :  { %321 = vmatpush.msrb.mxu2 %v288_v57  ;;  %341 = vmatpush.msrb.mxu0 %v289_v61  ;;  %v298_v61 = vld [vmem:[%s2058_s4 + $0x230] sm:$0xff] }
  0x12   :  { %322 = vmatpush.msrb.mxu2 %v282_v0  ;;  %342 = vmatpush.msrb.mxu0 %v283_v1 }
  0x14   :  { %323 = vmatpush.msrb.mxu2 %v276_v4  ;;  %343 = vmatpush.msrb.mxu0 %v277_v5  ;;  %v286_v5 = vld [vmem:[%s2058_s4 + $0x1d0] sm:$0xff] }
  0x15   :  { %1022 = vmatmul.msk.f32.gmra.mxu0 %vm65_vm0, %v56_v8  ;;  %v270_v8 = vld [vmem:[%s2058_s4 + $0x150] sm:$0xff] }
  0x16   :  { %324 = vmatpush.msrb.mxu2 %v270_v8 }
  0x1d   :  { %1023 = vmatmul.msk.f32.gmra.mxu0 %vm65_vm0, %v57_v9  ;;  %v271_v9 = vld [vmem:[%s2058_s4 + $0x158] sm:$0xff] }
  0x1e   :  { %344 = vmatpush.msrb.mxu0 %v271_v9  ;;  %v280_v9 = vld [vmem:[%s2058_s4 + $0x1a0] sm:$0xff] }
  0x8a   :  { %v95_v10 = vpop.f32.mrf.mxu0 }
  0x8b   :  { %v96_v18 = vadd.f32 %v95_v10, %v33_v11  ;;  %v296_v10 = vld [vmem:[%s2058_s4 + $0x220] sm:$0xff] }
  0x8c   :  { %360 = vmatpush.msra.mxu1 %v296_v10  ;;  %v236_v10 = vld [vmem:[%s2058_s4 + $0x40] sm:$0xff] }
  0x8d   :  { %v108_v22 = vsel %vm107_vm1, %v96_v18, 0.0 }
  0x90   :  { %v104_v12 = vpop.f32.mrf.mxu2 }
  0x91   :  { %v105_v13 = vadd.f32 %v104_v12, %v33_v11 }
  0x92   :  { %v98_v14 = vpop.f32.mrf.mxu0 }
  0x93   :  { %v99_v15 = vadd.f32 %v98_v14, %v33_v11  ;;  %v117_v16 = vsel %vm107_vm1, %v105_v13, 0.0  ;;  %v264_v14 = vld [vmem:[%s2058_s4 + $0x120] sm:$0xff] }
  0x94   :  { %118 = vadd.xlane.f32.xlu0 %v117_v16  ;;  %325 = vmatpush.msrb.mxu2 %v264_v14  ;;  %v274_v14 = vld [vmem:[%s2058_s4 + $0x170] sm:$0xff] }
  0x95   :  { %v111_v17 = vsel %vm107_vm1, %v99_v15, 0.0 }
  0x96   :  { %112 = vadd.xlane.f32.xlu1 %v111_v17  ;;  %v284_v17 = vld [vmem:[%s2058_s4 + $0x1c0] sm:$0xff] }
  0x9a   :  { %v101_v19 = vpop.f32.mrf.mxu0 }
  0x9b   :  { %v102_v20 = vadd.f32 %v101_v19, %v33_v11  ;;  %v290_v11 = vld [vmem:[%s2058_s4 + $0x1f0] sm:$0xff] }
  0x9c   :  { %361 = vmatpush.msra.mxu1 %v290_v11  ;;  %v279_v11 = vld [vmem:[%s2058_s4 + $0x198] sm:$0xff] }
  0x9d   :  { %v114_v21 = vsel %vm107_vm1, %v102_v20, 0.0 }
  0x9e   :  { %115 = vadd.xlane.f32.xlu0 %v114_v21  ;;  %109 = vadd.xlane.f32.xlu1 %v108_v22  ;;  %v258_v22 = vld [vmem:[%s2058_s4 + $0xf0] sm:$0xff] }
  0x9f   :  { %362 = vmatpush.msra.mxu1 %v284_v17  ;;  %326 = vmatpush.msrb.mxu2 %v258_v22  ;;  %v268_v17 = vld [vmem:[%s2058_s4 + $0x140] sm:$0xff]  ;;  %v261_v22 = vld [vmem:[%s2058_s4 + $0x108] sm:$0xff] }
 0x107   :  { %v119_v23 = vpop.xlane.xlu0 %118 }
 0x108   :  { %v123_v24 = vmul.f32 0.010416667, %v119_v23  ;;  %v259_v23 = vld [vmem:[%s2058_s4 + $0xf8] sm:$0xff] }
 0x109   :  { %v113_v25 = vpop.xlane.xlu1 %112 }
 0x10a   :  { %v1144_v26 = vsub.f32 %v105_v13, %v123_v24  ;;  %v121_v27 = vmul.f32 0.010416667, %v113_v25 }
 0x10c   :  { %v1146_v28 = vsub.f32 %v99_v15, %v121_v27  ;;  %v131_v29 = vmul.f32 %v1144_v26, %v1144_v26  ;;  %v265_v15 = vld [vmem:[%s2058_s4 + $0x128] sm:$0xff]  ;;  %v278_v27 = vld [vmem:[%s2058_s4 + $0x190] sm:$0xff] }
 0x10d   :  { %345 = vmatpush.msrb.mxu0 %v265_v15  ;;  %363 = vmatpush.msra.mxu1 %v278_v27  ;;  %v299_v15 = vld [vmem:[%s2058_s4 + $0x238] sm:$0xff] }
 0x10e   :  { %v141_v30 = vsel %vm107_vm1, %v131_v29, 0.0  ;;  %v129_v31 = vmul.f32 %v1146_v28, %v1146_v28  ;;  %v263_v27 = vld [vmem:[%s2058_s4 + $0x118] sm:$0xff] }
 0x10f   :  { %142 = vadd.xlane.f32.xlu2 %v141_v30  ;;  %346 = vmatpush.msrb.mxu0 %v259_v23  ;;  %v281_v23 = vld [vmem:[%s2058_s4 + $0x1a8] sm:$0xff] }
 0x110   :  { %v135_v32 = vsel %vm107_vm1, %v129_v31, 0.0  ;;  %v1253_v31 = vld [vmem:[%s2057_s2 + $0x4] ss:$0 sm:$0xff] }
 0x111   :  { %v116_v33 = vpop.xlane.xlu0 %115  ;;  %136 = vadd.xlane.f32.xlu0 %v135_v32  ;;  %v110_v34 = vpop.xlane.xlu1 %109  ;;  %v253_v32 = vld [vmem:[%s2058_s4 + $0xc8] sm:$0xff] }
 0x112   :  { %v122_v35 = vmul.f32 0.010416667, %v116_v33  ;;  %v120_v36 = vmul.f32 0.010416667, %v110_v34  ;;  %347 = vmatpush.msrb.mxu0 %v253_v32  ;;  %v230_v32 = vld [vmem:[%s2058_s4 + $0x10] sm:$0xff] }
 0x114   :  { %v1154_v37 = vsub.f32 %v102_v20, %v122_v35  ;;  %v1156_v38 = vsub.f32 %v96_v18, %v120_v36  ;;  %v1233_v20 = vld [vmem:[%s2057_s2 + $0x3] ss:$0 sm:$0xff] }
 0x115   :  { %v272_v35 = vld [vmem:[%s2058_s4 + $0x160] sm:$0xff] }
 0x116   :  { %v130_v39 = vmul.f32 %v1154_v37, %v1154_v37  ;;  %v128_v40 = vmul.f32 %v1156_v38, %v1156_v38  ;;  %364 = vmatpush.msra.mxu1 %v272_v35  ;;  %v233_v35 = vld [vmem:[%s2058_s4 + $0x28] sm:$0xff] }
 0x118   :  { %v138_v41 = vsel %vm107_vm1, %v130_v39, 0.0  ;;  %v132_v42 = vsel %vm107_vm1, %v128_v40, 0.0  ;;  %v246_v39 = vld [vmem:[%s2058_s4 + $0x90] sm:$0xff]  ;;  %v243_v40 = vld [vmem:[%s2058_s4 + $0x78] sm:$0xff] }
 0x119   :  { %139 = vadd.xlane.f32.xlu2 %v138_v41  ;;  %133 = vadd.xlane.f32.xlu1 %v132_v42 }
 0x182   :  { %v143_v43 = vpop.xlane.xlu2 %142 }
 0x183   :  { %v147_v44 = vmul.f32 0.010416667, %v143_v43  ;;  %v247_v43 = vld [vmem:[%s2058_s4 + $0x98] sm:$0xff] }
 0x184   :  { %v137_v45 = vpop.xlane.xlu0 %136  ;;  %348 = vmatpush.msrb.mxu0 %v247_v43  ;;  %v238_v43 = vld [vmem:[%s2058_s4 + $0x50] sm:$0xff] }
 0x185   :  { %v151_v46 = vadd.f32 1e-06, %v147_v44  ;;  %v145_v47 = vmul.f32 0.010416667, %v137_v45  ;;  %v266_v44 = vld [vmem:[%s2058_s4 + $0x130] sm:$0xff] }
 0x186   :  { %365 = vmatpush.msra.mxu1 %v266_v44  ;;  %v231_v44 = vld [vmem:[%s2058_s4 + $0x18] sm:$0xff] }
 0x187   :  { %1042 = vrsqrt.f32 %v151_v46  ;;  %v1164_v48 = vadd.f32 1e-06, %v145_v47  ;;  %vm188_vm3 = vweird.f32 %v151_v46  ;;  %v240_v47 = vld [vmem:[%s2058_s4 + $0x60] sm:$0xff] }
 0x189   :  { %1044 = vrsqrt.f32 %v1164_v48  ;;  %vm168_vm6 = vweird.f32 %v1164_v48 }
 0x18c   :  { %v140_v49 = vpop.xlane.xlu2 %139  ;;  %v134_v50 = vpop.xlane.xlu1 %133 }
 0x18d   :  { %v1043_v51 = vpop.eup %1042  ;;  %v146_v52 = vmul.f32 0.010416667, %v140_v49  ;;  %v144_v53 = vmul.f32 0.010416667, %v134_v50  ;;  %v241_v49 = vld [vmem:[%s2058_s4 + $0x68] sm:$0xff]  ;;  %v260_v50 = vld [vmem:[%s2058_s4 + $0x100] sm:$0xff] }
 0x18e   :  { %v183_v54 = vmul.f32 %v1043_v51, %v151_v46  ;;  %vm189_vm2 = vweird.f32 %v1043_v51  ;;  %349 = vmatpush.msrb.mxu0 %v241_v49  ;;  %366 = vmatpush.msra.mxu1 %v260_v50 }
 0x18f   :  { %v1176_v58 = vpop.eup %1044  ;;  %v1178_v59 = vadd.f32 1e-06, %v146_v52  ;;  %v1180_v60 = vadd.f32 1e-06, %v144_v53  ;;  %vm190_vm4 = vmor %vm188_vm3, %vm189_vm2  ;;  %v234_v52 = vld [vmem:[%s2058_s4 + $0x30] sm:$0xff]  ;;  %vm788_vm3 = vcmask 523264  }
 0x190   :  { %v184_v62 = vmul.f32 %v1043_v51, %v183_v54  ;;  %v163_v63 = vmul.f32 %v1176_v58, %v1164_v48  ;;  %vm169_vm5 = vweird.f32 %v1176_v58  ;;  %350 = vmatpush.msrb.mxu0 %v235_v55  ;;  %367 = vmatpush.msra.mxu1 %v254_v56 }
 0x191   :  { %1046 = vrsqrt.f32 %v1178_v59  ;;  %vm1272_vm7 = vmor %vm168_vm6, %vm169_vm5  ;;  %vm178_vm10 = vweird.f32 %v1178_v59  ;;  %vm158_vm12 = vweird.f32 %v1180_v60  ;;  %vm938_vm5 = vcmask 15360  }
 0x192   :  { %v185_v2 = vmul.f32 0.5, %v184_v62  ;;  %v164_v3 = vmul.f32 %v1176_v58, %v163_v63  ;;  %1048 = vrsqrt.f32 %v1180_v60  ;;  %v297_v63 = vld [vmem:[%s2058_s4 + $0x228] sm:$0xff]  ;;  %vm1003_vm6 = vcmask 254976  }
 0x194   :  { %v186_v6 = vsub.f32 1.5, %v185_v2  ;;  %v165_v7 = vmul.f32 0.5, %v164_v3  ;;  %v292_v2 = vld [vmem:[%s2058_s4 + $0x200] sm:$0xff] }
 0x196   :  { %v166_v12 = vsub.f32 1.5, %v165_v7  ;;  %v187_v13 = vmul.f32 %v1043_v51, %v186_v6  ;;  %v242_v6 = vld [vmem:[%s2058_s4 + $0x70] sm:$0xff]  ;;  %v285_v7 = vld [vmem:[%s2058_s4 + $0x1c8] sm:$0xff] }
 0x197   :  { %v1220_v16 = vpop.eup %1046 }
 0x198   :  { %v1226_v18 = vpop.eup %1048  ;;  %v173_v19 = vmul.f32 %v1220_v16, %v1178_v59  ;;  %v191_v21 = vsel %vm190_vm4, %v1043_v51, %v187_v13  ;;  %v167_v29 = vmul.f32 %v1176_v58, %v166_v12  ;;  %vm179_vm8 = vweird.f32 %v1220_v16  ;;  %v32_v13 = vld [vmem:[%s2057_s2] sm:$0x3] }
 0x199   :  { %v153_v24 = vmul.f32 %v1226_v18, %v1180_v60  ;;  %v195_v25 = vmul.f32 %v191_v21, %v1144_v26  ;;  %v252_v26 = vld [vmem:[%s2058_s4 + $0xc0] sm:$0xff]  ;;  %vm159_vm9 = vweird.f32 %v1226_v18  ;;  %vm180_vm11 = vmor %vm178_vm10, %vm179_vm8  ;;  %v229_v60 = vld [vmem:[%s2058_s4 + $0x8] sm:$0xff]  ;;  %vm926_vm4 = vcmask 9216  }
 0x19a   :  { %v174_v30 = vmul.f32 %v1220_v16, %v173_v19  ;;  %327 = vmatpush.msrb.mxu2 %v252_v26  ;;  %v171_v46 = vsel %vm1272_vm7, %v1176_v58, %v167_v29  ;;  %vm160_vm13 = vmor %vm158_vm12, %vm159_vm9  ;;  %v228_v58 = vld [vmem:[%s2058_s4] sm:$0xff]  ;;  %351 = vmatpush.msrb.mxu0 %v229_v60  ;;  %v267_v19 = vld [vmem:[%s2058_s4 + $0x138] sm:$0xff]  ;;  %vm1008_vm7 = vcmask 1024  }
 0x19b   :  { %v154_v33 = vmul.f32 %v1226_v18, %v153_v24  ;;  %v199_v34 = vmul.f32 %v195_v25, %v1233_v20  ;;  %v193_v54 = vmul.f32 %v171_v46, %v1146_v28  ;;  %v287_v21 = vld [vmem:[%s2058_s4 + $0x1d8] sm:$0xff]  ;;  %v269_v25 = vld [vmem:[%s2058_s4 + $0x148] sm:$0xff] }
 0x19c   :  { %v175_v36 = vmul.f32 0.5, %v174_v30  ;;  %328 = vmatpush.msrb.mxu2 %v246_v39  ;;  %380 = vmatpush.msra.mxu0 %v297_v63  ;;  %v275_v24 = vld [vmem:[%s2058_s4 + $0x178] sm:$0xff]  ;;  %v257_v29 = vld [vmem:[%s2058_s4 + $0xe8] sm:$0xff]  ;;  %v250_v39 = vld [vmem:[%s2058_s4 + $0xb0] sm:$0xff] }
 0x19d   :  { %v155_v41 = vmul.f32 0.5, %v154_v33  ;;  %v203_v42 = vadd.f32 %v199_v34, %v1253_v31  ;;  %v197_v1 = vmul.f32 %v193_v54, %v1233_v20  ;;  %v251_v30 = vld [vmem:[%s2058_s4 + $0xb8] sm:$0xff]  ;;  %v256_v34 = vld [vmem:[%s2058_s4 + $0xe0] sm:$0xff] }
 0x19e   :  { %v176_v45 = vsub.f32 1.5, %v175_v36  ;;  %329 = vmatpush.msrb.mxu2 %v240_v47  ;;  %v239_v26 = vld [vmem:[%s2058_s4 + $0x58] sm:$0xff]  ;;  %v249_v36 = vld [vmem:[%s2058_s4 + $0xa8] sm:$0xff] }
 0x19f   :  { %v156_v48 = vsub.f32 1.5, %v155_v41  ;;  %220 = vmatpush.msra.mxu3 %v203_v42  ;;  %v201_v8 = vadd.f32 %v197_v1, %v1253_v31  ;;  %v255_v33 = vld [vmem:[%s2058_s4 + $0xd8] sm:$0xff]  ;;  %v244_v41 = vld [vmem:[%s2058_s4 + $0x80] sm:$0xff]  ;;  %v237_v42 = vld [vmem:[%s2058_s4 + $0x48] sm:$0xff] }
 0x1a0   :  { %v177_v51 = vmul.f32 %v1220_v16, %v176_v45  ;;  %330 = vmatpush.msrb.mxu2 %v234_v52  ;;  %v232_v45 = vld [vmem:[%s2058_s4 + $0x20] sm:$0xff] }
 0x1a1   :  { %v157_v53 = vmul.f32 %v1226_v18, %v156_v48  ;;  %v1014_v47 = vld [vmem:[%s2057_s2 + $0x5] ss:$8 sm:$0xf] }
 0x1a2   :  { %v181_v57 = vsel %vm180_vm11, %v1220_v16, %v177_v51  ;;  %331 = vmatpush.msrb.mxu2 %v228_v58  ;;  %v273_v16 = vld [vmem:[%s2058_s4 + $0x168] sm:$0xff] }
 0x1a3   :  { %v194_v28 = vmul.f32 %v181_v57, %v1154_v37  ;;  %v161_v59 = vsel %vm160_vm13, %v1226_v18, %v157_v53  ;;  %v248_v37 = vld [vmem:[%s2058_s4 + $0xa0] sm:$0xff]  ;;  %v293_v18 = vld [vmem:[%s2058_s4 + $0x208] sm:$0xff] }
 0x1a4   :  { %v192_v62 = vmul.f32 %v161_v59, %v1156_v38  ;;  %400 = vmatpush.msra.mxu2 %v298_v61  ;;  %v291_v38 = vld [vmem:[%s2058_s4 + $0x1f8] sm:$0xff]  ;;  %368 = vmatpush.msra.mxu1 %v248_v37  ;;  %v1015_v48 = vld [vmem:[%s2057_s2 + $0x5] ss:$8 sm:$0x30] }
 0x1a5   :  { %v198_v0 = vmul.f32 %v194_v28, %v1233_v20  ;;  %381 = vmatpush.msra.mxu0 %v291_v38  ;;  %v39_v49 = vor.u32 %v1015_v48, %v1014_v47  ;;  %v589_v48 = vld [vmem:[%s2060_s6 + $0xb0] sm:$0xff] }
 0x1a6   :  { %v196_v4 = vmul.f32 %v192_v62, %v1233_v20  ;;  %401 = vmatpush.msra.mxu2 %v292_v2  ;;  %369 = vmatpush.msra.mxu1 %v242_v6  ;;  %v262_v20 = vld [vmem:[%s2058_s4 + $0x110] sm:$0xff] }
 0x1a7   :  { %v202_v3 = vadd.f32 %v198_v0, %v1253_v31  ;;  %382 = vmatpush.msra.mxu0 %v285_v7  ;;  %v302_v51 = vperm.slane %v39_v49, 1  ;;  %v303_v52 = vperm.slane %v39_v49, 2  ;;  %v301_v53 = vperm.slane %v39_v49, 0 }
 0x1a8   :  { %402 = vmatpush.msra.mxu2 %v286_v5  ;;  %v200_v12 = vadd.f32 %v196_v4, %v1253_v31  ;;  %370 = vmatpush.msra.mxu1 %v236_v10  ;;  %v245_v31 = vld [vmem:[%s2058_s4 + $0x88] sm:$0xff]  ;;  %v304_v28 = vperm.slane %v39_v49, 3  ;;  %v306_v37 = vperm.slane %v39_v49, 5  ;;  %v305_v1 = vperm.slane %v39_v49, 4  ;;  %v575_v49 = vld [vmem:[%s2060_s6 + $0x40] sm:$0xff] }
 0x1a9   :  { %221 = vmatpush.msra.mxu3 %v202_v3  ;;  %383 = vmatpush.msra.mxu0 %v279_v11 }
 0x1aa   :  { %403 = vmatpush.msra.mxu2 %v280_v9  ;;  %371 = vmatpush.msra.mxu1 %v230_v32  ;;  %v578_v32 = vld [vmem:[%s2060_s6 + $0x58] sm:$0xff] }
 0x1ab   :  { %222 = vmatpush.msra.mxu3 %v201_v8  ;;  %384 = vmatpush.msra.mxu0 %v273_v16  ;;  %v597_v16 = vld [vmem:[%s2060_s6 + $0xf0] sm:$0xff] }
 0x1ac   :  { %404 = vmatpush.msra.mxu2 %v274_v14  ;;  %v540_v14 = vld [vmem:[%s2059_s5 + $0x8] sm:$0xff] }
 0x1ad   :  { %223 = vmatpush.msra.mxu3 %v200_v12  ;;  %385 = vmatpush.msra.mxu0 %v267_v19  ;;  %v542_v12 = vld [vmem:[%s2059_s5 + $0x18] sm:$0xff]  ;;  %v538_v19 = vld [vmem:[%s2061_s1] sm:$0x3] }
 0x1ae   :  { %1025 = vmatmul.msk.f32.vlgmr.msra.gmra.mxu3 %vm204_vm14, %v32_v13  ;;  %405 = vmatpush.msra.mxu2 %v268_v17  ;;  %v541_v13 = vld [vmem:[%s2059_s5 + $0x10] sm:$0xff]  ;;  %v539_v17 = vld [vmem:[%s2059_s5] sm:$0xff] }
 0x1af   :  { %420 = vmatpush.msrb.mxu3 %v299_v15  ;;  %386 = vmatpush.msra.mxu0 %v261_v22  ;;  %v598_v15 = vld [vmem:[%s2060_s6 + $0xf8] sm:$0xff]  ;;  %v581_v22 = vld [vmem:[%s2060_s6 + $0x70] sm:$0xff] }
 0x1b0   :  { %406 = vmatpush.msra.mxu2 %v262_v20  ;;  %558 = vmatpush.msrb.mxu1 %v542_v12  ;;  %v582_v20 = vld [vmem:[%s2060_s6 + $0x78] sm:$0xff]  ;;  %v568_v12 = vld [vmem:[%s2060_s6 + $0x8] sm:$0xff] }
 0x1b1   :  { %421 = vmatpush.msrb.mxu3 %v293_v18  ;;  %387 = vmatpush.msra.mxu0 %v255_v33  ;;  %v596_v18 = vld [vmem:[%s2060_s6 + $0xe8] sm:$0xff] }
 0x1b2   :  { %407 = vmatpush.msra.mxu2 %v256_v34  ;;  %559 = vmatpush.msrb.mxu1 %v541_v13  ;;  %v591_v34 = vld [vmem:[%s2060_s6 + $0xc0] sm:$0xff]  ;;  %v584_v13 = vld [vmem:[%s2060_s6 + $0x88] sm:$0xff] }
 0x1b3   :  { %422 = vmatpush.msrb.mxu3 %v287_v21  ;;  %388 = vmatpush.msra.mxu0 %v249_v36  ;;  %v595_v21 = vld [vmem:[%s2060_s6 + $0xe0] sm:$0xff] }
 0x1b4   :  { %408 = vmatpush.msra.mxu2 %v250_v39  ;;  %560 = vmatpush.msrb.mxu1 %v540_v14  ;;  %v611_v14 = vld [vmem:[%s2060_s6 + $0x160] sm:$0xff] }
 0x1b5   :  { %423 = vmatpush.msrb.mxu3 %v281_v23  ;;  %389 = vmatpush.msra.mxu0 %v243_v40  ;;  %v594_v23 = vld [vmem:[%s2060_s6 + $0xd8] sm:$0xff] }
 0x1b6   :  { %409 = vmatpush.msra.mxu2 %v244_v41  ;;  %561 = vmatpush.msrb.mxu1 %v539_v17  ;;  %v583_v17 = vld [vmem:[%s2060_s6 + $0x80] sm:$0xff] }
 0x1b7   :  { %424 = vmatpush.msrb.mxu3 %v275_v24  ;;  %390 = vmatpush.msra.mxu0 %v237_v42  ;;  %v614_v24 = vld [vmem:[%s2060_s6 + $0x178] sm:$0xff] }
 0x1b8   :  { %410 = vmatpush.msra.mxu2 %v238_v43  ;;  %v590_v42 = vld [vmem:[%s2060_s6 + $0xb8] sm:$0xff]  ;;  %v576_v43 = vld [vmem:[%s2060_s6 + $0x48] sm:$0xff] }
 0x1b9   :  { %425 = vmatpush.msrb.mxu3 %v269_v25  ;;  %391 = vmatpush.msra.mxu0 %v231_v44  ;;  %v580_v25 = vld [vmem:[%s2060_s6 + $0x68] sm:$0xff] }
 0x1ba   :  { %411 = vmatpush.msra.mxu2 %v232_v45 }
 0x1bb   :  { %426 = vmatpush.msrb.mxu3 %v263_v27  ;;  %v593_v27 = vld [vmem:[%s2060_s6 + $0xd0] sm:$0xff] }
 0x1bd   :  { %427 = vmatpush.msrb.mxu3 %v257_v29  ;;  %v630_v29 = vld [vmem:[%s2060_s6 + $0x1f8] sm:$0xff] }
 0x1bf   :  { %428 = vmatpush.msrb.mxu3 %v251_v30  ;;  %v579_v30 = vld [vmem:[%s2060_s6 + $0x60] sm:$0xff] }
 0x1c1   :  { %429 = vmatpush.msrb.mxu3 %v245_v31  ;;  %v592_v31 = vld [vmem:[%s2060_s6 + $0xc8] sm:$0xff] }
 0x1c3   :  { %430 = vmatpush.msrb.mxu3 %v239_v26 }
 0x1c5   :  { %431 = vmatpush.msrb.mxu3 %v233_v35  ;;  %v577_v35 = vld [vmem:[%s2060_s6 + $0x50] sm:$0xff] }
 0x1c7   :  { %723 = vmatpush.msra.mxu3 %v630_v29  ;;  %v624_v29 = vld [vmem:[%s2060_s6 + $0x1c8] sm:$0xff] }
 0x231   :  { %v225_v46 = vpop.f32.mrf.mxu3 }
 0x232   :  { %1026 = vmatmul.msk.f32.vlgmr.msrb.gmra.mxu2 %vm107_vm1, %v225_v46  ;;  %1027 = vmatmul.msk.f32.vlgmr.msrb.gmra.mxu0 %vm107_vm1, %v225_v46 }
 0x233   :  { %1028 = vmatmul.msk.f32.vlgmr.msra.gmra.mxu1 %vm107_vm1, %v225_v46  ;;  %1031 = vmatmul.msk.f32.vlgmr.msrb.gmra.mxu3 %vm107_vm1, %v225_v46 }
 0x234   :  { %683 = vmatpush.msrb.mxu0 %v598_v15  ;;  %663 = vmatpush.msra.mxu1 %v582_v20  ;;  %v627_v15 = vld [vmem:[%s2060_s6 + $0x1e0] sm:$0xff]  ;;  %v646_v20 = vld [vmem:[%s2060_s6 + $0x278] sm:$0xff] }
 0x235   :  { %703 = vmatpush.msrb.mxu2 %v614_v24  ;;  %v645_v24 = vld [vmem:[%s2060_s6 + $0x270] sm:$0xff] }
 0x236   :  { %684 = vmatpush.msrb.mxu0 %v597_v16  ;;  %664 = vmatpush.msra.mxu1 %v581_v22  ;;  %v567_v16 = vld [vmem:[%s2060_s6] sm:$0xff]  ;;  %v609_v22 = vld [vmem:[%s2060_s6 + $0x150] sm:$0xff] }
 0x238   :  { %685 = vmatpush.msrb.mxu0 %v596_v18  ;;  %665 = vmatpush.msra.mxu1 %v580_v25  ;;  %v610_v18 = vld [vmem:[%s2060_s6 + $0x158] sm:$0xff]  ;;  %v661_v25 = vld [vmem:[%s2060_s6 + $0x2f0] sm:$0xff] }
 0x23a   :  { %1029 = vmatmul.msk.f32.vlgmr.msra.gmra.mxu0 %vm107_vm1, %v225_v46  ;;  %1030 = vmatmul.msk.f32.vlgmr.msra.gmra.mxu2 %vm107_vm1, %v225_v46 }
 0x23b   :  { %1032 = vmatmul.msk.f32.vlgmr.msrb.gmra.mxu1 %vm204_vm14, %v538_v19  ;;  %686 = vmatpush.msrb.mxu0 %v595_v21  ;;  %v626_v19 = vld [vmem:[%s2060_s6 + $0x1d8] sm:$0xff] }
 0x23c   :  { %666 = vmatpush.msra.mxu1 %v579_v30  ;;  %v662_v21 = vld [vmem:[%s2060_s6 + $0x2f8] sm:$0xff]  ;;  %v644_v30 = vld [vmem:[%s2060_s6 + $0x268] sm:$0xff] }
 0x23d   :  { %687 = vmatpush.msrb.mxu0 %v594_v23  ;;  %v625_v23 = vld [vmem:[%s2060_s6 + $0x1d0] sm:$0xff] }
 0x23e   :  { %667 = vmatpush.msra.mxu1 %v578_v32  ;;  %v623_v32 = vld [vmem:[%s2060_s6 + $0x1c0] sm:$0xff] }
 0x23f   :  { %688 = vmatpush.msrb.mxu0 %v593_v27  ;;  %v608_v27 = vld [vmem:[%s2060_s6 + $0x148] sm:$0xff] }
 0x240   :  { %668 = vmatpush.msra.mxu1 %v577_v35  ;;  %v606_v35 = vld [vmem:[%s2060_s6 + $0x138] sm:$0xff] }
 0x241   :  { %689 = vmatpush.msrb.mxu0 %v592_v31  ;;  %v660_v31 = vld [vmem:[%s2060_s6 + $0x2e8] sm:$0xff] }
 0x242   :  { %669 = vmatpush.msra.mxu1 %v576_v43  ;;  %v642_v43 = vld [vmem:[%s2060_s6 + $0x258] sm:$0xff] }
 0x243   :  { %690 = vmatpush.msrb.mxu0 %v591_v34  ;;  %v659_v34 = vld [vmem:[%s2060_s6 + $0x2e0] sm:$0xff] }
 0x244   :  { %670 = vmatpush.msra.mxu1 %v575_v49  ;;  %v657_v49 = vld [vmem:[%s2060_s6 + $0x2d0] sm:$0xff] }
 0x245   :  { %691 = vmatpush.msrb.mxu0 %v590_v42  ;;  %v622_v42 = vld [vmem:[%s2060_s6 + $0x1b8] sm:$0xff] }
 0x247   :  { %692 = vmatpush.msrb.mxu0 %v589_v48  ;;  %v641_v48 = vld [vmem:[%s2060_s6 + $0x250] sm:$0xff] }
 0x2af   :  { %v353_v50 = vpop.f32.mrf.mxu0 }
 0x2b0   :  { %v373_v54 = vpop.f32.mrf.mxu1  ;;  %v1467_v55 = vadd.f32 %v353_v50, %v302_v51 }
 0x2b1   :  { %v1469_v57 = vadd.f32 %v373_v54, %v303_v52  ;;  %v588_v54 = vld [vmem:[%s2060_s6 + $0xa8] sm:$0xff] }
 0x2b2   :  { %v438_v60 = vsel %vm436_vm15, %v1467_v55, 0.0  ;;  %693 = vmatpush.msrb.mxu0 %v588_v54  ;;  %v656_v54 = vld [vmem:[%s2060_s6 + $0x2c8] sm:$0xff] }
 0x2b3   :  { %v440_v63 = vsel %vm436_vm15, %v1469_v57, 0.0 }
 0x2b5   :  { %v333_v56 = vpop.f32.mrf.mxu2 }
 0x2b6   :  { %v1471_v58 = vadd.f32 %v333_v56, %v301_v53  ;;  %v433_v2 = vpop.f32.mrf.mxu3  ;;  %v574_v56 = vld [vmem:[%s2060_s6 + $0x38] sm:$0xff] }
 0x2b7   :  { %v393_v59 = vpop.f32.mrf.mxu0  ;;  %v1479_v4 = vadd.f32 %v433_v2, %v306_v37  ;;  %671 = vmatpush.msra.mxu1 %v574_v56  ;;  %v572_v37 = vld [vmem:[%s2060_s6 + $0x28] sm:$0xff]  ;;  %v571_v2 = vld [vmem:[%s2060_s6 + $0x20] sm:$0xff] }
 0x2b8   :  { %v437_v61 = vsel %vm436_vm15, %v1471_v58, 0.0  ;;  %v394_v0 = vadd.f32 %v393_v59, %v304_v28  ;;  %v587_v28 = vld [vmem:[%s2060_s6 + $0xa0] sm:$0xff] }
 0x2b9   :  { %v439_v62 = vadd.f32 %v438_v60, %v437_v61  ;;  %v446_v10 = vsel %vm436_vm15, %v1479_v4, 0.0  ;;  %v573_v60 = vld [vmem:[%s2060_s6 + $0x30] sm:$0xff]  ;;  %694 = vmatpush.msrb.mxu0 %v587_v28  ;;  %v619_v56 = vld [vmem:[%s2060_s6 + $0x1a0] sm:$0xff]  ;;  %v602_v28 = vld [vmem:[%s2060_s6 + $0x118] sm:$0xff] }
 0x2ba   :  { %v442_v5 = vsel %vm436_vm15, %v394_v0, 0.0  ;;  %672 = vmatpush.msra.mxu1 %v573_v60  ;;  %v638_v60 = vld [vmem:[%s2060_s6 + $0x238] sm:$0xff] }
 0x2bb   :  { %v441_v38 = vadd.f32 %v440_v63, %v439_v62 }
 0x2bc   :  { %673 = vmatpush.msra.mxu1 %v572_v37  ;;  %v637_v37 = vld [vmem:[%s2060_s6 + $0x230] sm:$0xff] }
 0x2bd   :  { %v413_v3 = vpop.f32.mrf.mxu2  ;;  %v443_v7 = vadd.f32 %v442_v5, %v441_v38  ;;  %v586_v5 = vld [vmem:[%s2060_s6 + $0x98] sm:$0xff] }
 0x2be   :  { %v414_v6 = vadd.f32 %v413_v3, %v305_v1  ;;  %674 = vmatpush.msra.mxu1 %v571_v2  ;;  %695 = vmatpush.msrb.mxu0 %v586_v5  ;;  %v616_v2 = vld [vmem:[%s2060_s6 + $0x188] sm:$0xff]  ;;  %v615_v5 = vld [vmem:[%s2060_s6 + $0x180] sm:$0xff] }
 0x2c0   :  { %v444_v8 = vsel %vm436_vm15, %v414_v6, 0.0 }
 0x2c1   :  { %v445_v9 = vadd.f32 %v444_v8, %v443_v7  ;;  %v629_v7 = vld [vmem:[%s2060_s6 + $0x1f0] sm:$0xff] }
 0x2c2   :  { %724 = vmatpush.msra.mxu3 %v629_v7  ;;  %v569_v8 = vld [vmem:[%s2060_s6 + $0x10] sm:$0xff]  ;;  %v651_v7 = vld [vmem:[%s2060_s6 + $0x2a0] sm:$0xff] }
 0x2c3   :  { %v447_v11 = vadd.f32 %v446_v10, %v445_v9  ;;  %v585_v9 = vld [vmem:[%s2060_s6 + $0x90] sm:$0xff]  ;;  %v612_v10 = vld [vmem:[%s2060_s6 + $0x168] sm:$0xff] }
 0x2c4   :  { %696 = vmatpush.msrb.mxu0 %v585_v9  ;;  %v634_v9 = vld [vmem:[%s2060_s6 + $0x218] sm:$0xff] }
 0x2c5   :  { %448 = vadd.xlane.f32.xlu2 %v447_v11  ;;  %v628_v11 = vld [vmem:[%s2060_s6 + $0x1e8] sm:$0xff] }
 0x2c6   :  { %725 = vmatpush.msra.mxu3 %v628_v11  ;;  %697 = vmatpush.msrb.mxu0 %v584_v13  ;;  %v649_v13 = vld [vmem:[%s2060_s6 + $0x290] sm:$0xff] }
 0x2c8   :  { %726 = vmatpush.msra.mxu3 %v627_v15  ;;  %698 = vmatpush.msrb.mxu0 %v583_v17  ;;  %v632_v15 = vld [vmem:[%s2060_s6 + $0x208] sm:$0xff]  ;;  %v631_v17 = vld [vmem:[%s2060_s6 + $0x200] sm:$0xff] }
 0x2ca   :  { %727 = vmatpush.msra.mxu3 %v626_v19  ;;  %763 = vmatpush.msra.mxu0 %v662_v21  ;;  %v48_v19 = vld [vmem:[%s2057_s2 + $0x30] ss:$0 sm:$0xff]  ;;  %v835_v21 = vld [vmem:[%s2062_s7 + $0x168] sm:$0xff] }
 0x2cc   :  { %728 = vmatpush.msra.mxu3 %v625_v23  ;;  %764 = vmatpush.msra.mxu0 %v661_v25  ;;  %v833_v25 = vld [vmem:[%s2062_s7 + $0x158] sm:$0xff] }
 0x2ce   :  { %729 = vmatpush.msra.mxu3 %v624_v29  ;;  %765 = vmatpush.msra.mxu0 %v660_v31  ;;  %v829_v29 = vld [vmem:[%s2062_s7 + $0x138] sm:$0xff] }
 0x2d0   :  { %730 = vmatpush.msra.mxu3 %v623_v32  ;;  %766 = vmatpush.msra.mxu0 %v659_v34  ;;  %v1016_v32 = vld [vmem:[%s2057_s2 + $0x6] ss:$8 sm:$0xf] }
 0x2d1   :  { %v827_v34 = vld [vmem:[%s2062_s7 + $0x128] sm:$0xff] }
 0x2d2   :  { %731 = vmatpush.msra.mxu3 %v622_v42  ;;  %v1018_v42 = vld [vmem:[%s2057_s2 + $0x7] ss:$8 sm:$0xf] }
 0x338   :  { %v449_v26 = vpop.xlane.xlu2 %448 }
 0x339   :  { %v450_v33 = vmul.f32 0.0013020834, %v449_v26  ;;  %v607_v26 = vld [vmem:[%s2060_s6 + $0x140] sm:$0xff] }
 0x33b   :  { %v1550_v36 = vsub.f32 %v1471_v58, %v450_v33  ;;  %v1553_v39 = vsub.f32 %v1467_v55, %v450_v33  ;;  %v1556_v40 = vsub.f32 %v1469_v57, %v450_v33  ;;  %v1558_v41 = vsub.f32 %v394_v0, %v450_v33 }
 0x33c   :  { %v1566_v44 = vsub.f32 %v414_v6, %v450_v33  ;;  %v1581_v50 = vsub.f32 %v1479_v4, %v450_v33  ;;  %v570_v4 = vld [vmem:[%s2060_s6 + $0x18] sm:$0xff]  ;;  %v613_v6 = vld [vmem:[%s2060_s6 + $0x170] sm:$0xff]  ;;  %v643_v33 = vld [vmem:[%s2060_s6 + $0x260] sm:$0xff] }
 0x33d   :  { %v457_v45 = vmul.f32 %v1550_v36, %v1550_v36  ;;  %v458_v46 = vmul.f32 %v1553_v39, %v1553_v39  ;;  %v459_v47 = vmul.f32 %v1556_v40, %v1556_v40  ;;  %v460_v51 = vmul.f32 %v1558_v41, %v1558_v41  ;;  %675 = vmatpush.msra.mxu1 %v570_v4  ;;  %v599_v4 = vld [vmem:[%s2060_s6 + $0x100] sm:$0xff] }
 0x33e   :  { %v461_v57 = vmul.f32 %v1566_v44, %v1566_v44  ;;  %v462_v61 = vmul.f32 %v1581_v50, %v1581_v50  ;;  %704 = vmatpush.msrb.mxu2 %v613_v6  ;;  %v635_v6 = vld [vmem:[%s2060_s6 + $0x220] sm:$0xff] }
 0x33f   :  { %v463_v52 = vsel %vm436_vm15, %v457_v45, 0.0  ;;  %v464_v53 = vsel %vm436_vm15, %v458_v46, 0.0  ;;  %v466_v58 = vsel %vm436_vm15, %v459_v47, 0.0  ;;  %v468_v62 = vsel %vm436_vm15, %v460_v51, 0.0  ;;  %676 = vmatpush.msra.mxu1 %v569_v8  ;;  %v658_v45 = vld [vmem:[%s2060_s6 + $0x2d8] sm:$0xff]  ;;  %v605_v46 = vld [vmem:[%s2060_s6 + $0x130] sm:$0xff] }
 0x340   :  { %v465_v55 = vadd.f32 %v464_v53, %v463_v52  ;;  %v470_v0 = vsel %vm436_vm15, %v461_v57, 0.0  ;;  %v472_v38 = vsel %vm436_vm15, %v462_v61, 0.0  ;;  %705 = vmatpush.msrb.mxu2 %v612_v10  ;;  %767 = vmatpush.msra.mxu0 %v658_v45  ;;  %v621_v47 = vld [vmem:[%s2060_s6 + $0x1b0] sm:$0xff]  ;;  %v604_v51 = vld [vmem:[%s2060_s6 + $0x128] sm:$0xff]  ;;  %v639_v57 = vld [vmem:[%s2060_s6 + $0x240] sm:$0xff] }
 0x341   :  { %677 = vmatpush.msra.mxu1 %v568_v12  ;;  %732 = vmatpush.msra.mxu3 %v621_v47  ;;  %v620_v52 = vld [vmem:[%s2060_s6 + $0x1a8] sm:$0xff]  ;;  %v654_v61 = vld [vmem:[%s2060_s6 + $0x2b8] sm:$0xff]  ;;  %v633_v12 = vld [vmem:[%s2060_s6 + $0x210] sm:$0xff] }
 0x342   :  { %v467_v59 = vadd.f32 %v466_v58, %v465_v55  ;;  %706 = vmatpush.msrb.mxu2 %v611_v14  ;;  %768 = vmatpush.msra.mxu0 %v657_v49  ;;  %v640_v53 = vld [vmem:[%s2060_s6 + $0x248] sm:$0xff]  ;;  %v603_v55 = vld [vmem:[%s2060_s6 + $0x120] sm:$0xff]  ;;  %v650_v10 = vld [vmem:[%s2060_s6 + $0x298] sm:$0xff] }
 0x343   :  { %678 = vmatpush.msra.mxu1 %v567_v16  ;;  %733 = vmatpush.msra.mxu3 %v620_v52  ;;  %v655_v58 = vld [vmem:[%s2060_s6 + $0x2c0] sm:$0xff]  ;;  %v648_v16 = vld [vmem:[%s2060_s6 + $0x288] sm:$0xff]  ;;  %v824_v47 = vld [vmem:[%s2062_s7 + $0x110] sm:$0xff] }
 0x344   :  { %v469_v63 = vadd.f32 %v468_v62, %v467_v59  ;;  %707 = vmatpush.msrb.mxu2 %v610_v18  ;;  %769 = vmatpush.msra.mxu0 %v656_v54  ;;  %v618_v59 = vld [vmem:[%s2060_s6 + $0x198] sm:$0xff]  ;;  %v601_v62 = vld [vmem:[%s2060_s6 + $0x110] sm:$0xff]  ;;  %v647_v18 = vld [vmem:[%s2060_s6 + $0x280] sm:$0xff] }
 0x345   :  { %743 = vmatpush.msrb.mxu1 %v646_v20  ;;  %734 = vmatpush.msra.mxu3 %v619_v56  ;;  %v563_v20 = vpop.f32.mrf.mxu1  ;;  %v1019_v45 = vld [vmem:[%s2057_s2 + $0x7] ss:$8 sm:$0x30]  ;;  %v821_v52 = vld [vmem:[%s2062_s7 + $0xf8] sm:$0xff] }
 0x346   :  { %v471_v1 = vadd.f32 %v470_v0, %v469_v63  ;;  %708 = vmatpush.msrb.mxu2 %v609_v22  ;;  %770 = vmatpush.msra.mxu0 %v655_v58  ;;  %v617_v63 = vld [vmem:[%s2060_s6 + $0x190] sm:$0xff]  ;;  %v564_v23 = vadd.f32 %v563_v20, %v48_v19  ;;  %v818_v56 = vld [vmem:[%s2062_s7 + $0xe0] sm:$0xff] }
 0x347   :  { %744 = vmatpush.msrb.mxu1 %v645_v24  ;;  %735 = vmatpush.msra.mxu3 %v618_v59  ;;  %v653_v0 = vld [vmem:[%s2060_s6 + $0x2b0] sm:$0xff]  ;;  %v834_v19 = vld [vmem:[%s2062_s7 + $0x160] sm:$0xff] }
 0x348   :  { %v473_v3 = vadd.f32 %v472_v38, %v471_v1  ;;  %709 = vmatpush.msrb.mxu2 %v608_v27  ;;  %771 = vmatpush.msra.mxu0 %v654_v61  ;;  %v600_v1 = vld [vmem:[%s2060_s6 + $0x108] sm:$0xff]  ;;  %v836_v22 = vld [vmem:[%s2062_s7 + $0x170] sm:$0xff]  ;;  %v566_v27 = vmax.f32 %v564_v23, 0.0 }
 0x349   :  { %745 = vmatpush.msrb.mxu1 %v644_v30  ;;  %736 = vmatpush.msra.mxu3 %v617_v63  ;;  %v636_v38 = vld [vmem:[%s2060_s6 + $0x228] sm:$0xff]  ;;  %v832_v24 = vld [vmem:[%s2062_s7 + $0x150] sm:$0xff]  ;;  %v830_v30 = vld [vmem:[%s2062_s7 + $0x140] sm:$0xff] }
 0x34a   :  { %474 = vadd.xlane.f32.xlu0 %v473_v3  ;;  %710 = vmatpush.msrb.mxu2 %v607_v26  ;;  %v652_v3 = vld [vmem:[%s2060_s6 + $0x2a8] sm:$0xff] }
 0x34b   :  { %746 = vmatpush.msrb.mxu1 %v643_v33  ;;  %772 = vmatpush.msra.mxu0 %v653_v0  ;;  %v826_v33 = vld [vmem:[%s2062_s7 + $0x120] sm:$0xff] }
 0x34c   :  { %711 = vmatpush.msrb.mxu2 %v606_v35  ;;  %737 = vmatpush.msra.mxu3 %v616_v2  ;;  %v1017_v35 = vld [vmem:[%s2057_s2 + $0x6] ss:$8 sm:$0x30] }
 0x34d   :  { %747 = vmatpush.msrb.mxu1 %v642_v43  ;;  %773 = vmatpush.msra.mxu0 %v652_v3  ;;  %v43_v49 = vor.u32 %v1017_v35, %v1016_v32  ;;  %v816_v32 = vld [vmem:[%s2062_s7 + $0xd0] sm:$0xff]  ;;  %v813_v35 = vld [vmem:[%s2062_s7 + $0xb8] sm:$0xff] }
 0x34e   :  { %712 = vmatpush.msrb.mxu2 %v605_v46  ;;  %738 = vmatpush.msra.mxu3 %v615_v5  ;;  %v823_v46 = vld [vmem:[%s2062_s7 + $0x108] sm:$0xff] }
 0x34f   :  { %748 = vmatpush.msrb.mxu1 %v641_v48  ;;  %774 = vmatpush.msra.mxu0 %v651_v7  ;;  %v495_v58 = vperm.slane %v43_v49, 0  ;;  %v496_v59 = vperm.slane %v43_v49, 1  ;;  %v498_v61 = vperm.slane %v43_v49, 3  ;;  %v499_v5 = vperm.slane %v43_v49, 4 }
 0x350   :  { %713 = vmatpush.msrb.mxu2 %v604_v51  ;;  %865 = vmatpush.msrb.mxu3 %v836_v22  ;;  %v820_v51 = vld [vmem:[%s2062_s7 + $0xf0] sm:$0xff]  ;;  %v500_v7 = vperm.slane %v43_v49, 5  ;;  %v831_v22 = vld [vmem:[%s2062_s7 + $0x148] sm:$0xff] }
 0x351   :  { %749 = vmatpush.msrb.mxu1 %v640_v53  ;;  %775 = vmatpush.msra.mxu0 %v650_v10  ;;  %v47_v53 = vor.u32 %v1019_v45, %v1018_v42  ;;  %v808_v42 = vld [vmem:[%s2062_s7 + $0x90] sm:$0xff]  ;;  %v810_v45 = vld [vmem:[%s2062_s7 + $0xa0] sm:$0xff] }
 0x352   :  { %714 = vmatpush.msrb.mxu2 %v603_v55  ;;  %866 = vmatpush.msrb.mxu3 %v833_v25  ;;  %v817_v55 = vld [vmem:[%s2062_s7 + $0xd8] sm:$0xff]  ;;  %v828_v25 = vld [vmem:[%s2062_s7 + $0x130] sm:$0xff] }
 0x353   :  { %750 = vmatpush.msrb.mxu1 %v639_v57  ;;  %776 = vmatpush.msra.mxu0 %v649_v13  ;;  %v515_v63 = vperm.slane %v47_v53, 1  ;;  %v517_v0 = vperm.slane %v47_v53, 3 }
 0x354   :  { %715 = vmatpush.msrb.mxu2 %v602_v28  ;;  %785 = vrot.lane.b32.xlu1 %v566_v27, %s1056_s30  ;;  %v514_v28 = vperm.slane %v47_v53, 0  ;;  %v825_v27 = vld [vmem:[%s2062_s7 + $0x118] sm:$0xff] }
 0x355   :  { %751 = vmatpush.msrb.mxu1 %v638_v60  ;;  %777 = vmatpush.msra.mxu0 %v648_v16  ;;  %v497_v60 = vperm.slane %v43_v49, 2  ;;  %v802_v49 = vld [vmem:[%s2062_s7 + $0x60] sm:$0xff] }
 0x356   :  { %716 = vmatpush.msrb.mxu2 %v601_v62  ;;  %867 = vmatpush.msrb.mxu3 %v830_v30  ;;  %v819_v30 = vld [vmem:[%s2062_s7 + $0xe8] sm:$0xff] }
 0x357   :  { %752 = vmatpush.msrb.mxu1 %v637_v37  ;;  %778 = vmatpush.msra.mxu0 %v647_v18  ;;  %v516_v37 = vperm.slane %v47_v53, 2 }
 0x358   :  { %717 = vmatpush.msrb.mxu2 %v600_v1  ;;  %868 = vmatpush.msrb.mxu3 %v827_v34  ;;  %v812_v34 = vld [vmem:[%s2062_s7 + $0xb0] sm:$0xff] }
 0x359   :  { %753 = vmatpush.msrb.mxu1 %v636_v38 }
 0x35a   :  { %718 = vmatpush.msrb.mxu2 %v599_v4  ;;  %869 = vmatpush.msrb.mxu3 %v824_v47  ;;  %v806_v47 = vld [vmem:[%s2062_s7 + $0x80] sm:$0xff] }
 0x35b   :  { %754 = vmatpush.msrb.mxu1 %v635_v6 }
 0x35c   :  { %845 = vmatpush.msra.mxu2 %v835_v21  ;;  %870 = vmatpush.msrb.mxu3 %v821_v52  ;;  %v804_v52 = vld [vmem:[%s2062_s7 + $0x70] sm:$0xff] }
 0x35d   :  { %755 = vmatpush.msrb.mxu1 %v634_v9 }
 0x35e   :  { %846 = vmatpush.msra.mxu2 %v832_v24  ;;  %871 = vmatpush.msrb.mxu3 %v818_v56  ;;  %v796_v56 = vld [vmem:[%s2062_s7 + $0x30] sm:$0xff] }
 0x35f   :  { %756 = vmatpush.msrb.mxu1 %v633_v12 }
 0x360   :  { %847 = vmatpush.msra.mxu2 %v829_v29  ;;  %v822_v29 = vld [vmem:[%s2062_s7 + $0x100] sm:$0xff] }
 0x361   :  { %757 = vmatpush.msrb.mxu1 %v632_v15 }
 0x362   :  { %848 = vmatpush.msra.mxu2 %v826_v33  ;;  %v811_v33 = vld [vmem:[%s2062_s7 + $0xa8] sm:$0xff] }
 0x363   :  { %758 = vmatpush.msrb.mxu1 %v631_v17 }
 0x364   :  { %849 = vmatpush.msra.mxu2 %v823_v46  ;;  %v805_v46 = vld [vmem:[%s2062_s7 + $0x78] sm:$0xff] }
 0x366   :  { %850 = vmatpush.msra.mxu2 %v820_v51  ;;  %v803_v51 = vld [vmem:[%s2062_s7 + $0x68] sm:$0xff] }
 0x368   :  { %851 = vmatpush.msra.mxu2 %v817_v55  ;;  %v801_v55 = vld [vmem:[%s2062_s7 + $0x58] sm:$0xff] }
 0x3bd   :  { %v475_v8 = vpop.xlane.xlu0 %474 }
 0x3be   :  { %v476_v11 = vmul.f32 0.0013020834, %v475_v8 }
 0x3c0   :  { %v477_v14 = vadd.f32 1e-06, %v476_v11 }
 0x3c2   :  { %1050 = vrsqrt.f32 %v477_v14  ;;  %vm484_vm1 = vweird.f32 %v477_v14 }
 0x3c8   :  { %v1051_v31 = vpop.eup %1050 }
 0x3c9   :  { %v479_v26 = vmul.f32 %v1051_v31, %v477_v14  ;;  %vm485_vm0 = vweird.f32 %v1051_v31 }
 0x3ca   :  { %vm486_vm2 = vmor %vm484_vm1, %vm485_vm0 }
 0x3cb   :  { %v480_v43 = vmul.f32 %v1051_v31, %v479_v26  ;;  %v815_v26 = vld [vmem:[%s2062_s7 + $0xc8] sm:$0xff] }
 0x3cc   :  { %872 = vmatpush.msrb.mxu3 %v815_v26  ;;  %v976_v26 = vld [vmem:[%s2063_s8 + $0x58] sm:$0xff] }
 0x3cd   :  { %v481_v48 = vmul.f32 0.5, %v480_v43  ;;  %v809_v43 = vld [vmem:[%s2062_s7 + $0x98] sm:$0xff] }
 0x3ce   :  { %873 = vmatpush.msrb.mxu3 %v812_v34  ;;  %v973_v34 = vld [vmem:[%s2063_s8 + $0x40] sm:$0xff] }
 0x3cf   :  { %v482_v54 = vsub.f32 1.5, %v481_v48  ;;  %v807_v48 = vld [vmem:[%s2062_s7 + $0x88] sm:$0xff] }
 0x3d0   :  { %874 = vmatpush.msrb.mxu3 %v809_v43  ;;  %v970_v43 = vld [vmem:[%s2063_s8 + $0x28] sm:$0xff] }
 0x3d1   :  { %v483_v57 = vmul.f32 %v1051_v31, %v482_v54  ;;  %v800_v54 = vld [vmem:[%s2062_s7 + $0x50] sm:$0xff] }
 0x3d2   :  { %875 = vmatpush.msrb.mxu3 %v806_v47  ;;  %v968_v47 = vld [vmem:[%s2063_s8 + $0x18] sm:$0xff] }
 0x3d3   :  { %v487_v62 = vsel %vm486_vm2, %v1051_v31, %v483_v57  ;;  %v814_v31 = vld [vmem:[%s2062_s7 + $0xc0] sm:$0xff]  ;;  %v797_v57 = vld [vmem:[%s2062_s7 + $0x38] sm:$0xff] }
 0x3d4   :  { %v488_v1 = vmul.f32 %v487_v62, %v1550_v36  ;;  %v489_v2 = vmul.f32 %v487_v62, %v1553_v39  ;;  %v490_v38 = vmul.f32 %v487_v62, %v1556_v40  ;;  %v491_v3 = vmul.f32 %v487_v62, %v1558_v41  ;;  %852 = vmatpush.msra.mxu2 %v814_v31  ;;  %v977_v31 = vld [vmem:[%s2063_s8 + $0x60] sm:$0xff] }
 0x3d5   :  { %v492_v4 = vmul.f32 %v487_v62, %v1566_v44  ;;  %v493_v6 = vmul.f32 %v487_v62, %v1581_v50  ;;  %v518_v39 = vperm.slane %v47_v53, 4  ;;  %v519_v40 = vperm.slane %v47_v53, 5  ;;  %v837_v50 = vld [vmem:[%s2062_s7 + $0x178] sm:$0xff]  ;;  %876 = vmatpush.msrb.mxu3 %v803_v51  ;;  %v799_v53 = vld [vmem:[%s2062_s7 + $0x48] sm:$0xff] }
 0x3d6   :  { %v507_v8 = vmul.f32 %v495_v58, %v488_v1  ;;  %v508_v9 = vmul.f32 %v496_v59, %v489_v2  ;;  %v509_v10 = vmul.f32 %v497_v60, %v490_v38  ;;  %v510_v11 = vmul.f32 %v498_v61, %v491_v3  ;;  %853 = vmatpush.msra.mxu2 %v811_v33  ;;  %v798_v58 = vld [vmem:[%s2062_s7 + $0x40] sm:$0xff]  ;;  %v795_v60 = vld [vmem:[%s2062_s7 + $0x28] sm:$0xff] }
 0x3d7   :  { %v511_v15 = vmul.f32 %v499_v5, %v492_v4  ;;  %v512_v16 = vmul.f32 %v500_v7, %v493_v6  ;;  %877 = vmatpush.msrb.mxu3 %v800_v54  ;;  %v794_v59 = vld [vmem:[%s2062_s7 + $0x20] sm:$0xff]  ;;  %v791_v62 = vld [vmem:[%s2062_s7 + $0x8] sm:$0xff] }
 0x3d8   :  { %v526_v12 = vadd.f32 %v514_v28, %v507_v8  ;;  %v527_v13 = vadd.f32 %v515_v63, %v508_v9  ;;  %v528_v14 = vadd.f32 %v516_v37, %v509_v10  ;;  %v529_v36 = vadd.f32 %v517_v0, %v510_v11  ;;  %854 = vmatpush.msra.mxu2 %v808_v42  ;;  %v793_v28 = vld [vmem:[%s2062_s7 + $0x18] sm:$0xff]  ;;  %v790_v61 = vld [vmem:[%s2062_s7] sm:$0xff]  ;;  %v792_v63 = vld [vmem:[%s2062_s7 + $0x10] sm:$0xff]  ;;  %v786_v11 = vpop.permute.xlu1 %785 }
 0x3d9   :  { %v530_v20 = vadd.f32 %v518_v39, %v511_v15  ;;  %v531_v21 = vadd.f32 %v519_v40, %v512_v16  ;;  %878 = vmatpush.msrb.mxu3 %v797_v57  ;;  %v49_v37 = vld [vmem:[%s2057_s2 + $0x31] ss:$0 sm:$0xff]  ;;  %v974_v33 = vld [vmem:[%s2063_s8 + $0x48] sm:$0xff] }
 0x3da   :  { %v532_v17 = vmax.f32 %v526_v12, 0.0  ;;  %v533_v41 = vmax.f32 %v527_v13, 0.0  ;;  %v534_v18 = vmax.f32 %v528_v14, 0.0  ;;  %v535_v44 = vmax.f32 %v529_v36, 0.0  ;;  %855 = vmatpush.msra.mxu2 %v805_v46  ;;  %v971_v42 = vld [vmem:[%s2063_s8 + $0x30] sm:$0xff] }
 0x3db   :  { %v536_v23 = vmax.f32 %v530_v20, 0.0  ;;  %v537_v24 = vmax.f32 %v531_v21, 0.0  ;;  %879 = vmatpush.msrb.mxu3 %v794_v59  ;;  %v1020_v14 = vld [vmem:[%s2057_s2 + $0x32] ss:$8 sm:$0x7] }
 0x3dc   :  { %679 = vmatmul.f32.vlgmr.msra.gmra.mxu1 %v532_v17  ;;  %699 = vmatmul.f32.vlgmr.msrb.gmra.mxu0 %v533_v41  ;;  %v841_v36 = vperm.slane %v1020_v14, 2  ;;  %v840_v16 = vperm.slane %v1020_v14, 1  ;;  %v839_v40 = vperm.slane %v1020_v14, 0 }
 0x3dd   :  { %719 = vmatmul.f32.vlgmr.msrb.gmra.mxu2 %v534_v18  ;;  %739 = vmatmul.f32.vlgmr.msra.gmra.mxu3 %v535_v44 }
 0x3de   :  { %885 = vmatpush.msra.mxu1 %v837_v50  ;;  %856 = vmatpush.msra.mxu2 %v802_v49  ;;  %v966_v49 = vld [vmem:[%s2063_s8 + $0x8] sm:$0xff] }
 0x3df   :  { %880 = vmatpush.msrb.mxu3 %v791_v62 }
 0x3e0   :  { %886 = vmatpush.msra.mxu1 %v834_v19  ;;  %857 = vmatpush.msra.mxu2 %v799_v53  ;;  %v965_v53 = vld [vmem:[%s2063_s8] sm:$0xff] }
 0x3e2   :  { %887 = vmatpush.msra.mxu1 %v831_v22  ;;  %858 = vmatpush.msra.mxu2 %v796_v56 }
 0x3e4   :  { %759 = vmatmul.f32.vlgmr.msrb.gmra.mxu1 %v536_v23  ;;  %779 = vmatmul.f32.vlgmr.msra.gmra.mxu0 %v537_v24 }
 0x3e5   :  { %888 = vmatpush.msra.mxu1 %v828_v25  ;;  %859 = vmatpush.msra.mxu2 %v793_v28 }
 0x3e7   :  { %889 = vmatpush.msra.mxu1 %v825_v27  ;;  %860 = vmatpush.msra.mxu2 %v790_v61  ;;  %v980_v27 = vld [vmem:[%s2063_s8 + $0x78] sm:$0xff]  ;;  %v54_v61 = vld [vmem:[%s2057_s2 + $0x35] ss:$0 sm:$0xff] }
 0x3e8   :  { %981 = vmatpush.msra.mxu3 %v980_v27 }
 0x3e9   :  { %890 = vmatpush.msra.mxu1 %v822_v29  ;;  %v979_v29 = vld [vmem:[%s2063_s8 + $0x70] sm:$0xff] }
 0x3ea   :  { %982 = vmatpush.msra.mxu3 %v979_v29 }
 0x3eb   :  { %891 = vmatpush.msra.mxu1 %v819_v30  ;;  %v978_v30 = vld [vmem:[%s2063_s8 + $0x68] sm:$0xff] }
 0x3ec   :  { %983 = vmatpush.msra.mxu3 %v978_v30 }
 0x3ed   :  { %892 = vmatpush.msra.mxu1 %v816_v32  ;;  %v975_v32 = vld [vmem:[%s2063_s8 + $0x50] sm:$0xff] }
 0x3ee   :  { %984 = vmatpush.msra.mxu3 %v977_v31 }
 0x3ef   :  { %893 = vmatpush.msra.mxu1 %v813_v35  ;;  %v972_v35 = vld [vmem:[%s2063_s8 + $0x38] sm:$0xff] }
 0x3f0   :  { %985 = vmatpush.msra.mxu3 %v976_v26 }
 0x3f1   :  { %894 = vmatpush.msra.mxu1 %v810_v45  ;;  %v969_v45 = vld [vmem:[%s2063_s8 + $0x20] sm:$0xff] }
 0x3f2   :  { %986 = vmatpush.msra.mxu3 %v975_v32 }
 0x3f3   :  { %895 = vmatpush.msra.mxu1 %v807_v48  ;;  %v967_v48 = vld [vmem:[%s2063_s8 + $0x10] sm:$0xff] }
 0x3f4   :  { %987 = vmatpush.msra.mxu3 %v974_v33 }
 0x3f5   :  { %896 = vmatpush.msra.mxu1 %v804_v52 }
 0x3f6   :  { %988 = vmatpush.msra.mxu3 %v973_v34 }
 0x3f7   :  { %897 = vmatpush.msra.mxu1 %v801_v55  ;;  %v52_v55 = vld [vmem:[%s2057_s2 + $0x33] ss:$0 sm:$0xff] }
 0x3f8   :  { %989 = vmatpush.msra.mxu3 %v972_v35 }
 0x3f9   :  { %898 = vmatpush.msra.mxu1 %v798_v58  ;;  %v53_v58 = vld [vmem:[%s2057_s2 + $0x34] ss:$0 sm:$0xff] }
 0x3fa   :  { %990 = vmatpush.msra.mxu3 %v971_v42 }
 0x3fb   :  { %899 = vmatpush.msra.mxu1 %v795_v60 }
 0x3fc   :  { %991 = vmatpush.msra.mxu3 %v970_v43 }
 0x3fd   :  { %900 = vmatpush.msra.mxu1 %v792_v63 }
 0x3fe   :  { %992 = vmatpush.msra.mxu3 %v969_v45 }
 0x400   :  { %993 = vmatpush.msra.mxu3 %v968_v47 }
 0x402   :  { %994 = vmatpush.msra.mxu3 %v967_v48 }
 0x404   :  { %995 = vmatpush.msra.mxu3 %v966_v49 }
 0x406   :  { %996 = vmatpush.msra.mxu3 %v965_v53 }
 0x459   :  { %v680_v0 = vpop.f32.mrf.mxu1  ;;  %v700_v2 = vpop.f32.mrf.mxu0 }
 0x45a   :  { %v681_v1 = vadd.f32 %v680_v0, %v49_v37 }
 0x45c   :  { %v701_v38 = vadd.f32 %v700_v2, %v681_v1 }
 0x460   :  { %v720_v3 = vpop.f32.mrf.mxu2  ;;  %v740_v5 = vpop.f32.mrf.mxu3 }
 0x461   :  { %v721_v4 = vadd.f32 %v720_v3, %v701_v38  ;;  %v760_v7 = vpop.f32.mrf.mxu1  ;;  %v780_v9 = vpop.f32.mrf.mxu0 }
 0x463   :  { %v741_v6 = vadd.f32 %v740_v5, %v721_v4 }
 0x465   :  { %v761_v8 = vadd.f32 %v760_v7, %v741_v6 }
 0x467   :  { %v781_v10 = vadd.f32 %v780_v9, %v761_v8 }
 0x469   :  { %v783_v12 = vmax.f32 %v781_v10, 0.0 }
 0x46b   :  { %v789_v13 = vsel %vm788_vm3, %v783_v12, %v786_v11 }
 0x46c   :  { %861 = vmatmul.f32.vlgmr.msra.gmra.mxu2 %v789_v13  ;;  %881 = vmatmul.f32.vlgmr.msrb.gmra.mxu3 %v789_v13 }
 0x46d   :  { %901 = vmatmul.f32.vlgmr.msra.gmra.mxu1 %v789_v13 }
 0x4ea   :  { %v902_v15 = vpop.f32.mrf.mxu1 }
 0x4eb   :  { %v903_v39 = vadd.f32 %v902_v15, %v841_v36 }
 0x4ed   :  { %1033 = vmatpush.msk.msrb.mxu2 %vm436_vm15, %v903_v39 }
 0x4ef   :  { %v882_v17 = vpop.f32.mrf.mxu3  ;;  %v862_v41 = vpop.f32.mrf.mxu2 }
 0x4f0   :  { %v883_v18 = vadd.f32 %v882_v17, %v840_v16  ;;  %v863_v44 = vadd.f32 %v862_v41, %v839_v40 }
 0x4f2   :  { %920 = vmatpush.xpose.msrb.mxu0 %v883_v18 }
 0x4f5   :  { %921 = vmatmul.f32.vlgmr.msrb.gmra.mxu0 %v863_v44 }
 0x572   :  { %v922_v50 = vpop.f32.mrf.mxu0 }
 0x573   :  { %v925_v19 = vmul.f32 0.088388346, %v922_v50 }
 0x575   :  { %v927_v20 = vsel %vm926_vm4, %v925_v19, -inf }
 0x576   :  { %928 = vmax.xlane.f32.xlu2 %v927_v20 }
 0x5e9   :  { %v929_v21 = vpop.xlane.xlu2 %928 }
 0x5ea   :  { %v930_v22 = vsub.f32 %v925_v19, %v929_v21 }
 0x5ec   :  { %v931_v23 = vmul.f32 1.442695, %v930_v22 }
 0x5ee   :  { %1052 = vpow2.f32 %v931_v23 }
 0x5f4   :  { %v1053_v24 = vpop.eup %1052 }
 0x5f5   :  { %v933_v25 = vsel %vm926_vm4, %v1053_v24, 0.0 }
 0x5f6   :  { %934 = vadd.xlane.f32.xlu0 %v933_v25 }
 0x669   :  { %v935_v46 = vpop.xlane.xlu0 %934 }
 0x66a   :  { %1054 = vrcp.f32 %v935_v46 }
 0x670   :  { %v1055_v51 = vpop.eup %1054 }
 0x671   :  { %v937_v52 = vmul.f32 %v1055_v51, %v1053_v24 }
 0x673   :  { %1034 = vmatmul.msk.f32.vlgmr.msrb.gmra.mxu2 %vm938_vm5, %v937_v52 }
 0x6f6   :  { %v962_v54 = vpop.f32.mrf.mxu2 }
 0x6f7   :  { %997 = vmatmul.f32.vlgmr.msra.gmra.mxu3 %v962_v54 }
 0x77a   :  { %v998_v56 = vpop.f32.mrf.mxu3 }
 0x77b   :  { %v999_v57 = vadd.f32 %v998_v56, %v52_v55 }
 0x77d   :  { %v1001_v28 = vmax.f32 %v999_v57, 0.0 }
 0x77f   :  { %v1002_v59 = vmul.f32 %v1001_v28, %v53_v58 }
 0x781   :  { %v1004_v60 = vsel %vm1003_vm6, %v1002_v59, 0.0 }
 0x782   :  { %1005 = vadd.xlane.f32.xlu2 %v1004_v60 }
 0x7f5   :  { %v1006_v62 = vpop.xlane.xlu2 %1005 }
 0x7f6   :  { %v1007_v63 = vadd.f32 %v1006_v62, %v54_v61 }
 0x7f8   :  { %1009 = vst.msk [vmem:[%s2064_s9] sm:$0x3] %vm1008_vm7, %v1007_v63 }

</bundles_post_ra>
